<compile_context>
chip_gen: v7x
topology: tpu7x:2x2x1
jax: 0.10.0
libtpu: 0.0.40
codegen_flags: <defaults>
</compile_context>

<pallas_src>
import functools
import math

import jax
import jax.numpy as jnp
from jax.experimental import pallas as pl
from jax.experimental.pallas import tpu as pltpu

# ---- small deterministic BERT config ----
VOCAB = 100
HIDDEN = 32
N_HEADS = 4
HEAD_DIM = HIDDEN // N_HEADS
INTER = 64
N_LAYERS = 2
MAX_POS = 16
LN_EPS = 1e-12
_INV_SQRT2 = 1.0 / math.sqrt(2.0)


# ---------------- fused encoder kernel ----------------
def _layernorm(x, g, b):
    mu = jnp.mean(x, axis=-1, keepdims=True)
    var = jnp.mean(jnp.square(x - mu), axis=-1, keepdims=True)
    return (x - mu) * jax.lax.rsqrt(var + LN_EPS) * g + b


def _encoder_kernel(emb_ref, mask_ref, eg_ref, eb_ref,
                    wqkv_ref, bqkv_ref, wo_ref, bo_ref, ln1g_ref, ln1b_ref,
                    wi_ref, bi_ref, wf_ref, bf_ref, ln2g_ref, ln2b_ref,
                    o_ref, *, scale):
    # One batch element per grid step: emb (S, H); mask (1, S) additive.
    add_mask = mask_ref[...]                                        # (1, S)

    # embedding LayerNorm
    h = _layernorm(emb_ref[...].astype(jnp.float32), eg_ref[...], eb_ref[...])

    for l in range(N_LAYERS):                                       # unrolled
        x = h                                                       # (S, H)

        # fused Q|K|V projection: (S, H) @ (H, 3H) + bias  (one matmul)
        qkv = (jnp.dot(x, wqkv_ref[l], preferred_element_type=jnp.float32)
               + bqkv_ref[l])                                       # (S, 3H)

        # multi-head attention: heads unrolled, static slices, no transposes.
        # Per-head output projection is accumulated directly (no lane concat).
        wo_l = wo_ref[l]                                            # (H, H)
        attn = None
        for hh in range(N_HEADS):
            lo = hh * HEAD_DIM
            q = qkv[:, lo:lo + HEAD_DIM]                            # (S, dh)
            k = qkv[:, HIDDEN + lo:HIDDEN + lo + HEAD_DIM]
            v = qkv[:, 2 * HIDDEN + lo:2 * HIDDEN + lo + HEAD_DIM]
            s = jax.lax.dot_general(q, k, (((1,), (1,)), ((), ())),
                                    preferred_element_type=jnp.float32)
            s = s * scale + add_mask                                # (S, S)
            s_max = jnp.max(s, axis=-1, keepdims=True)
            e = jnp.exp(s - s_max)
            p = e * pl.reciprocal(jnp.sum(e, axis=-1, keepdims=True),
                                  approx=True)                      # EUP slot
            ctx_h = jnp.dot(p, v, preferred_element_type=jnp.float32)  # (S, dh)
            contrib = jnp.dot(ctx_h, wo_l[lo:lo + HEAD_DIM, :],
                              preferred_element_type=jnp.float32)   # (S, H)
            attn = contrib if attn is None else attn + contrib
        attn = attn + bo_ref[l]

        # residual + LayerNorm
        h1 = _layernorm(attn + x, ln1g_ref[l], ln1b_ref[l])

        # FFN with exact erf-based GELU (HF "gelu"), fused in-kernel
        inter = (jnp.dot(h1, wi_ref[l], preferred_element_type=jnp.float32)
                 + bi_ref[l])                                       # (S, INTER)
        inter = 0.5 * inter * (1.0 + jax.lax.erf(inter * _INV_SQRT2))
        ffn = (jnp.dot(inter, wf_ref[l], preferred_element_type=jnp.float32)
               + bf_ref[l])
        h = _layernorm(ffn + h1, ln2g_ref[l], ln2b_ref[l])

    # Only the CLS token of the final layer leaves the kernel.
    o_ref[...] = h[0:1, :].astype(o_ref.dtype)                      # (1, H)


# ---------------- parameters (per-layer weights stacked on a layer axis) ----
def init_params(key):
    def normal(k, shape, std=0.02):
        return std * jax.random.normal(k, shape, jnp.float32)

    keys = iter(jax.random.split(key, 64))
    ones = jnp.ones((N_LAYERS, 1, HIDDEN), jnp.float32)
    zeros = jnp.zeros((N_LAYERS, 1, HIDDEN), jnp.float32)
    return {
        "word_emb": normal(next(keys), (VOCAB, HIDDEN)),
        "pos_emb": normal(next(keys), (MAX_POS, HIDDEN)),
        "type_emb": normal(next(keys), (2, HIDDEN)),
        "emb_ln_g": jnp.ones((1, HIDDEN), jnp.float32),
        "emb_ln_b": jnp.zeros((1, HIDDEN), jnp.float32),
        "wqkv": normal(next(keys), (N_LAYERS, HIDDEN, 3 * HIDDEN)),
        "bqkv": jnp.zeros((N_LAYERS, 1, 3 * HIDDEN), jnp.float32),
        "wo": normal(next(keys), (N_LAYERS, HIDDEN, HIDDEN)),
        "bo": zeros,
        "ln1_g": ones, "ln1_b": zeros,
        "wi": normal(next(keys), (N_LAYERS, HIDDEN, INTER)),
        "bi": jnp.zeros((N_LAYERS, 1, INTER), jnp.float32),
        "wf": normal(next(keys), (N_LAYERS, INTER, HIDDEN)),
        "bf": zeros,
        "ln2_g": ones, "ln2_b": zeros,
    }


# ---------------- forward (= BertEncoder.forward, returning CLS) ----------------
def bert_encoder_forward(params, input_ids, attention_mask):
    b, s = input_ids.shape

    # embeddings: word + position + token_type(=0)  (gather stays in plain JAX)
    we = jnp.take(params["word_emb"], input_ids, axis=0)            # (B,S,H)
    pe = params["pos_emb"][:s][None, :, :]                          # (1,S,H)
    te = params["type_emb"][0][None, None, :]                       # (1,1,H)
    emb = we + pe + te                                              # (B,S,H)

    # HF extended attention mask: (1 - mask) * finfo(dtype).min  (additive)
    add_mask = ((1.0 - attention_mask.astype(jnp.float32))
                * jnp.finfo(jnp.float32).min).reshape(b, 1, s)

    scale = 1.0 / math.sqrt(HEAD_DIM)

    def full(arr):
        # whole-array block, constant index -> DMA'd once, VMEM-resident
        return pl.BlockSpec(arr.shape, lambda i, _n=arr.ndim: (0,) * _n)

    in_specs = [
        pl.BlockSpec((None, s, HIDDEN), lambda i: (i, 0, 0)),       # emb
        pl.BlockSpec((None, 1, s), lambda i: (i, 0, 0)),            # mask
        full(params["emb_ln_g"]), full(params["emb_ln_b"]),
        full(params["wqkv"]), full(params["bqkv"]),
        full(params["wo"]), full(params["bo"]),
        full(params["ln1_g"]), full(params["ln1_b"]),
        full(params["wi"]), full(params["bi"]),
        full(params["wf"]), full(params["bf"]),
        full(params["ln2_g"]), full(params["ln2_b"]),
    ]

    cls = pl.pallas_call(
        functools.partial(_encoder_kernel, scale=scale),
        out_shape=jax.ShapeDtypeStruct((b, 1, HIDDEN), jnp.float32),
        grid=(b,),
        in_specs=in_specs,
        out_specs=pl.BlockSpec((None, 1, HIDDEN), lambda i: (i, 0, 0)),
        compiler_params=pltpu.CompilerParams(
            dimension_semantics=("parallel",)),
    )(emb, add_mask,
      params["emb_ln_g"], params["emb_ln_b"],
      params["wqkv"], params["bqkv"],
      params["wo"], params["bo"],
      params["ln1_g"], params["ln1_b"],
      params["wi"], params["bi"],
      params["wf"], params["bf"],
      params["ln2_g"], params["ln2_b"])

    return cls.reshape(b, HIDDEN)                                   # output[:, 0, :]


if __name__ == "__main__":
    key = jax.random.PRNGKey(0)
    pkey, ikey = jax.random.split(key)
    params = init_params(pkey)

    B, S = 2, 8
    # deterministic stand-in for BertTokenizer output
    # TODO(synk): string tokenization (BertTokenizer) has no Pallas equivalent.
    input_ids = jax.random.randint(ikey, (B, S), 0, VOCAB, dtype=jnp.int32)
    input_ids = input_ids.at[:, 0].set(1)                 # [CLS]-like token
    attention_mask = jnp.ones((B, S), jnp.int32).at[1, 6:].set(0)  # pad tail of batch 1

    cls = jax.jit(bert_encoder_forward)(params, input_ids, attention_mask)
    jax.block_until_ready(cls)
    assert cls.shape == (B, HIDDEN) and cls.dtype == jnp.float32
    print("KERNEL_OK")
</pallas_src>

<mosaic_0001>
module attributes {stable_mosaic.version = 11 : i64} {
  func.func @_encoder_kernel(%arg0: i32, %arg1: memref<1x8x32xf32, #tpu.memory_space<vmem>>, %arg2: memref<1x1x8xf32, #tpu.memory_space<vmem>>, %arg3: memref<1x32xf32, #tpu.memory_space<vmem>>, %arg4: memref<1x32xf32, #tpu.memory_space<vmem>>, %arg5: memref<2x32x96xf32, #tpu.memory_space<vmem>>, %arg6: memref<2x1x96xf32, #tpu.memory_space<vmem>>, %arg7: memref<2x32x32xf32, #tpu.memory_space<vmem>>, %arg8: memref<2x1x32xf32, #tpu.memory_space<vmem>>, %arg9: memref<2x1x32xf32, #tpu.memory_space<vmem>>, %arg10: memref<2x1x32xf32, #tpu.memory_space<vmem>>, %arg11: memref<2x32x64xf32, #tpu.memory_space<vmem>>, %arg12: memref<2x1x64xf32, #tpu.memory_space<vmem>>, %arg13: memref<2x64x32xf32, #tpu.memory_space<vmem>>, %arg14: memref<2x1x32xf32, #tpu.memory_space<vmem>>, %arg15: memref<2x1x32xf32, #tpu.memory_space<vmem>>, %arg16: memref<2x1x32xf32, #tpu.memory_space<vmem>>, %arg17: memref<1x1x32xf32, #tpu.memory_space<vmem>>) attributes {dimension_semantics = [#tpu.dimension_semantics<parallel>], iteration_bounds = array<i64: 2>, scalar_prefetch = 0 : i64, scratch_operands = 0 : i64, tpu.core_type = #tpu.core_type<tc>, window_params = [{transform_indices = @transform_0, window_bounds = array<i64: 1, 8, 32>}, {transform_indices = @transform_1, window_bounds = array<i64: 1, 1, 8>}, {pipeline_mode = #tpu.pipeline_mode<synchronous>, transform_indices = @transform_2, window_bounds = array<i64: 1, 32>}, {pipeline_mode = #tpu.pipeline_mode<synchronous>, transform_indices = @transform_3, window_bounds = array<i64: 1, 32>}, {pipeline_mode = #tpu.pipeline_mode<synchronous>, transform_indices = @transform_4, window_bounds = array<i64: 2, 32, 96>}, {pipeline_mode = #tpu.pipeline_mode<synchronous>, transform_indices = @transform_5, window_bounds = array<i64: 2, 1, 96>}, {pipeline_mode = #tpu.pipeline_mode<synchronous>, transform_indices = @transform_6, window_bounds = array<i64: 2, 32, 32>}, {pipeline_mode = #tpu.pipeline_mode<synchronous>, transform_indices = @transform_7, window_bounds = array<i64: 2, 1, 32>}, {pipeline_mode = #tpu.pipeline_mode<synchronous>, transform_indices = @transform_8, window_bounds = array<i64: 2, 1, 32>}, {pipeline_mode = #tpu.pipeline_mode<synchronous>, transform_indices = @transform_9, window_bounds = array<i64: 2, 1, 32>}, {pipeline_mode = #tpu.pipeline_mode<synchronous>, transform_indices = @transform_10, window_bounds = array<i64: 2, 32, 64>}, {pipeline_mode = #tpu.pipeline_mode<synchronous>, transform_indices = @transform_11, window_bounds = array<i64: 2, 1, 64>}, {pipeline_mode = #tpu.pipeline_mode<synchronous>, transform_indices = @transform_12, window_bounds = array<i64: 2, 64, 32>}, {pipeline_mode = #tpu.pipeline_mode<synchronous>, transform_indices = @transform_13, window_bounds = array<i64: 2, 1, 32>}, {pipeline_mode = #tpu.pipeline_mode<synchronous>, transform_indices = @transform_14, window_bounds = array<i64: 2, 1, 32>}, {pipeline_mode = #tpu.pipeline_mode<synchronous>, transform_indices = @transform_15, window_bounds = array<i64: 2, 1, 32>}, {transform_indices = @transform_16, window_bounds = array<i64: 1, 1, 32>}]} {
    %c0 = arith.constant 0 : index
    %c0_0 = arith.constant 0 : index
    %c0_1 = arith.constant 0 : index
    %0 = vector.load %arg2[%c0, %c0_0, %c0_1] : memref<1x1x8xf32, #tpu.memory_space<vmem>>, vector<1x1x8xf32>
    %1 = vector.shape_cast %0 : vector<1x1x8xf32> to vector<1x8xf32>
    %c0_2 = arith.constant 0 : index
    %c0_3 = arith.constant 0 : index
    %c0_4 = arith.constant 0 : index
    %2 = vector.load %arg1[%c0_2, %c0_3, %c0_4] : memref<1x8x32xf32, #tpu.memory_space<vmem>>, vector<1x8x32xf32>
    %3 = vector.shape_cast %2 : vector<1x8x32xf32> to vector<8x32xf32>
    %c0_5 = arith.constant 0 : index
    %c0_6 = arith.constant 0 : index
    %4 = vector.load %arg3[%c0_5, %c0_6] : memref<1x32xf32, #tpu.memory_space<vmem>>, vector<1x32xf32>
    %c0_7 = arith.constant 0 : index
    %c0_8 = arith.constant 0 : index
    %5 = vector.load %arg4[%c0_7, %c0_8] : memref<1x32xf32, #tpu.memory_space<vmem>>, vector<1x32xf32>
    %cst = arith.constant dense<0.000000e+00> : vector<8xf32>
    %6 = vector.multi_reduction <add>, %3, %cst [1] : vector<8x32xf32> to vector<8xf32>
    %7 = vector.shape_cast %6 : vector<8xf32> to vector<8x1xf32>
    %cst_9 = arith.constant 3.200000e+01 : f32
    %8 = vector.broadcast %cst_9 : f32 to vector<8x1xf32>
    %9 = arith.divf %7, %8 : vector<8x1xf32>
    %10 = vector.broadcast %9 : vector<8x1xf32> to vector<8x32xf32>
    %11 = arith.subf %3, %10 : vector<8x32xf32>
    %12 = arith.mulf %11, %11 : vector<8x32xf32>
    %cst_10 = arith.constant dense<0.000000e+00> : vector<8xf32>
    %13 = vector.multi_reduction <add>, %12, %cst_10 [1] : vector<8x32xf32> to vector<8xf32>
    %14 = vector.shape_cast %13 : vector<8xf32> to vector<8x1xf32>
    %cst_11 = arith.constant 3.200000e+01 : f32
    %15 = vector.broadcast %cst_11 : f32 to vector<8x1xf32>
    %16 = arith.divf %14, %15 : vector<8x1xf32>
    %17 = vector.broadcast %9 : vector<8x1xf32> to vector<8x32xf32>
    %18 = arith.subf %3, %17 : vector<8x32xf32>
    %cst_12 = arith.constant 9.99999996E-13 : f32
    %19 = vector.broadcast %cst_12 : f32 to vector<8x1xf32>
    %20 = arith.addf %16, %19 : vector<8x1xf32>
    %21 = math.rsqrt %20 : vector<8x1xf32>
    %22 = vector.broadcast %21 : vector<8x1xf32> to vector<8x32xf32>
    %23 = arith.mulf %18, %22 : vector<8x32xf32>
    %24 = vector.broadcast %4 : vector<1x32xf32> to vector<8x32xf32>
    %25 = arith.mulf %23, %24 : vector<8x32xf32>
    %26 = vector.broadcast %5 : vector<1x32xf32> to vector<8x32xf32>
    %27 = arith.addf %25, %26 : vector<8x32xf32>
    %c0_13 = arith.constant 0 : index
    %c0_14 = arith.constant 0 : index
    %c0_15 = arith.constant 0 : index
    %28 = vector.load %arg5[%c0_13, %c0_14, %c0_15] : memref<2x32x96xf32, #tpu.memory_space<vmem>>, vector<1x32x96xf32>
    %29 = vector.shape_cast %28 : vector<1x32x96xf32> to vector<32x96xf32>
    %cst_16 = arith.constant dense<0.000000e+00> : vector<8x96xf32>
    %30 = tpu.matmul %27, %29, %cst_16 {dimension_numbers = #tpu.dot_dimension_numbers<[1], [0], [0], [1], [0, 0, 1, 1], [], []>} : vector<8x32xf32>, vector<32x96xf32>, vector<8x96xf32> -> vector<8x96xf32>
    %c0_17 = arith.constant 0 : index
    %c0_18 = arith.constant 0 : index
    %c0_19 = arith.constant 0 : index
    %31 = vector.load %arg6[%c0_17, %c0_18, %c0_19] : memref<2x1x96xf32, #tpu.memory_space<vmem>>, vector<1x1x96xf32>
    %32 = vector.shape_cast %31 : vector<1x1x96xf32> to vector<1x96xf32>
    %33 = vector.broadcast %32 : vector<1x96xf32> to vector<8x96xf32>
    %34 = arith.addf %30, %33 : vector<8x96xf32>
    %c0_20 = arith.constant 0 : index
    %c0_21 = arith.constant 0 : index
    %c0_22 = arith.constant 0 : index
    %35 = vector.load %arg7[%c0_20, %c0_21, %c0_22] : memref<2x32x32xf32, #tpu.memory_space<vmem>>, vector<1x32x32xf32>
    %36 = vector.shape_cast %35 : vector<1x32x32xf32> to vector<32x32xf32>
    %37 = vector.extract_strided_slice %34 {offsets = [0, 0], sizes = [8, 8], strides = [1, 1]} : vector<8x96xf32> to vector<8x8xf32>
    %38 = vector.extract_strided_slice %34 {offsets = [0, 32], sizes = [8, 8], strides = [1, 1]} : vector<8x96xf32> to vector<8x8xf32>
    %39 = vector.extract_strided_slice %34 {offsets = [0, 64], sizes = [8, 8], strides = [1, 1]} : vector<8x96xf32> to vector<8x8xf32>
    %cst_23 = arith.constant dense<0.000000e+00> : vector<8x8xf32>
    %40 = tpu.matmul %37, %38, %cst_23 {dimension_numbers = #tpu.dot_dimension_numbers<[1], [1], [0], [0], [0, 0, 1, 0], [], []>} : vector<8x8xf32>, vector<8x8xf32>, vector<8x8xf32> -> vector<8x8xf32>
    %cst_24 = arith.constant 0.353553385 : f32
    %41 = vector.broadcast %cst_24 : f32 to vector<8x8xf32>
    %42 = arith.mulf %40, %41 : vector<8x8xf32>
    %43 = vector.broadcast %1 : vector<1x8xf32> to vector<8x8xf32>
    %44 = arith.addf %42, %43 : vector<8x8xf32>
    %cst_25 = arith.constant dense<0xFF800000> : vector<8xf32>
    %45 = vector.multi_reduction <maximumf>, %44, %cst_25 [1] : vector<8x8xf32> to vector<8xf32>
    %46 = vector.shape_cast %45 : vector<8xf32> to vector<8x1xf32>
    %47 = vector.broadcast %46 : vector<8x1xf32> to vector<8x8xf32>
    %48 = arith.subf %44, %47 : vector<8x8xf32>
    %49 = math.exp %48 : vector<8x8xf32>
    %cst_26 = arith.constant dense<0.000000e+00> : vector<8xf32>
    %50 = vector.multi_reduction <add>, %49, %cst_26 [1] : vector<8x8xf32> to vector<8xf32>
    %51 = vector.shape_cast %50 : vector<8xf32> to vector<8x1xf32>
    %52 = tpu.reciprocal %51 {approx = true} : vector<8x1xf32> -> vector<8x1xf32>
    %53 = vector.broadcast %52 : vector<8x1xf32> to vector<8x8xf32>
    %54 = arith.mulf %49, %53 : vector<8x8xf32>
    %cst_27 = arith.constant dense<0.000000e+00> : vector<8x8xf32>
    %55 = tpu.matmul %54, %39, %cst_27 {dimension_numbers = #tpu.dot_dimension_numbers<[1], [0], [0], [1], [0, 0, 1, 1], [], []>} : vector<8x8xf32>, vector<8x8xf32>, vector<8x8xf32> -> vector<8x8xf32>
    %56 = vector.extract_strided_slice %36 {offsets = [0, 0], sizes = [8, 32], strides = [1, 1]} : vector<32x32xf32> to vector<8x32xf32>
    %cst_28 = arith.constant dense<0.000000e+00> : vector<8x32xf32>
    %57 = tpu.matmul %55, %56, %cst_28 {dimension_numbers = #tpu.dot_dimension_numbers<[1], [0], [0], [1], [0, 0, 1, 1], [], []>} : vector<8x8xf32>, vector<8x32xf32>, vector<8x32xf32> -> vector<8x32xf32>
    %58 = vector.extract_strided_slice %34 {offsets = [0, 8], sizes = [8, 8], strides = [1, 1]} : vector<8x96xf32> to vector<8x8xf32>
    %59 = vector.extract_strided_slice %34 {offsets = [0, 40], sizes = [8, 8], strides = [1, 1]} : vector<8x96xf32> to vector<8x8xf32>
    %60 = vector.extract_strided_slice %34 {offsets = [0, 72], sizes = [8, 8], strides = [1, 1]} : vector<8x96xf32> to vector<8x8xf32>
    %cst_29 = arith.constant dense<0.000000e+00> : vector<8x8xf32>
    %61 = tpu.matmul %58, %59, %cst_29 {dimension_numbers = #tpu.dot_dimension_numbers<[1], [1], [0], [0], [0, 0, 1, 0], [], []>} : vector<8x8xf32>, vector<8x8xf32>, vector<8x8xf32> -> vector<8x8xf32>
    %cst_30 = arith.constant 0.353553385 : f32
    %62 = vector.broadcast %cst_30 : f32 to vector<8x8xf32>
    %63 = arith.mulf %61, %62 : vector<8x8xf32>
    %64 = vector.broadcast %1 : vector<1x8xf32> to vector<8x8xf32>
    %65 = arith.addf %63, %64 : vector<8x8xf32>
    %cst_31 = arith.constant dense<0xFF800000> : vector<8xf32>
    %66 = vector.multi_reduction <maximumf>, %65, %cst_31 [1] : vector<8x8xf32> to vector<8xf32>
    %67 = vector.shape_cast %66 : vector<8xf32> to vector<8x1xf32>
    %68 = vector.broadcast %67 : vector<8x1xf32> to vector<8x8xf32>
    %69 = arith.subf %65, %68 : vector<8x8xf32>
    %70 = math.exp %69 : vector<8x8xf32>
    %cst_32 = arith.constant dense<0.000000e+00> : vector<8xf32>
    %71 = vector.multi_reduction <add>, %70, %cst_32 [1] : vector<8x8xf32> to vector<8xf32>
    %72 = vector.shape_cast %71 : vector<8xf32> to vector<8x1xf32>
    %73 = tpu.reciprocal %72 {approx = true} : vector<8x1xf32> -> vector<8x1xf32>
    %74 = vector.broadcast %73 : vector<8x1xf32> to vector<8x8xf32>
    %75 = arith.mulf %70, %74 : vector<8x8xf32>
    %cst_33 = arith.constant dense<0.000000e+00> : vector<8x8xf32>
    %76 = tpu.matmul %75, %60, %cst_33 {dimension_numbers = #tpu.dot_dimension_numbers<[1], [0], [0], [1], [0, 0, 1, 1], [], []>} : vector<8x8xf32>, vector<8x8xf32>, vector<8x8xf32> -> vector<8x8xf32>
    %77 = vector.extract_strided_slice %36 {offsets = [8, 0], sizes = [8, 32], strides = [1, 1]} : vector<32x32xf32> to vector<8x32xf32>
    %cst_34 = arith.constant dense<0.000000e+00> : vector<8x32xf32>
    %78 = tpu.matmul %76, %77, %cst_34 {dimension_numbers = #tpu.dot_dimension_numbers<[1], [0], [0], [1], [0, 0, 1, 1], [], []>} : vector<8x8xf32>, vector<8x32xf32>, vector<8x32xf32> -> vector<8x32xf32>
    %79 = arith.addf %57, %78 : vector<8x32xf32>
    %80 = vector.extract_strided_slice %34 {offsets = [0, 16], sizes = [8, 8], strides = [1, 1]} : vector<8x96xf32> to vector<8x8xf32>
    %81 = vector.extract_strided_slice %34 {offsets = [0, 48], sizes = [8, 8], strides = [1, 1]} : vector<8x96xf32> to vector<8x8xf32>
    %82 = vector.extract_strided_slice %34 {offsets = [0, 80], sizes = [8, 8], strides = [1, 1]} : vector<8x96xf32> to vector<8x8xf32>
    %cst_35 = arith.constant dense<0.000000e+00> : vector<8x8xf32>
    %83 = tpu.matmul %80, %81, %cst_35 {dimension_numbers = #tpu.dot_dimension_numbers<[1], [1], [0], [0], [0, 0, 1, 0], [], []>} : vector<8x8xf32>, vector<8x8xf32>, vector<8x8xf32> -> vector<8x8xf32>
    %cst_36 = arith.constant 0.353553385 : f32
    %84 = vector.broadcast %cst_36 : f32 to vector<8x8xf32>
    %85 = arith.mulf %83, %84 : vector<8x8xf32>
    %86 = vector.broadcast %1 : vector<1x8xf32> to vector<8x8xf32>
    %87 = arith.addf %85, %86 : vector<8x8xf32>
    %cst_37 = arith.constant dense<0xFF800000> : vector<8xf32>
    %88 = vector.multi_reduction <maximumf>, %87, %cst_37 [1] : vector<8x8xf32> to vector<8xf32>
    %89 = vector.shape_cast %88 : vector<8xf32> to vector<8x1xf32>
    %90 = vector.broadcast %89 : vector<8x1xf32> to vector<8x8xf32>
    %91 = arith.subf %87, %90 : vector<8x8xf32>
    %92 = math.exp %91 : vector<8x8xf32>
    %cst_38 = arith.constant dense<0.000000e+00> : vector<8xf32>
    %93 = vector.multi_reduction <add>, %92, %cst_38 [1] : vector<8x8xf32> to vector<8xf32>
    %94 = vector.shape_cast %93 : vector<8xf32> to vector<8x1xf32>
    %95 = tpu.reciprocal %94 {approx = true} : vector<8x1xf32> -> vector<8x1xf32>
    %96 = vector.broadcast %95 : vector<8x1xf32> to vector<8x8xf32>
    %97 = arith.mulf %92, %96 : vector<8x8xf32>
    %cst_39 = arith.constant dense<0.000000e+00> : vector<8x8xf32>
    %98 = tpu.matmul %97, %82, %cst_39 {dimension_numbers = #tpu.dot_dimension_numbers<[1], [0], [0], [1], [0, 0, 1, 1], [], []>} : vector<8x8xf32>, vector<8x8xf32>, vector<8x8xf32> -> vector<8x8xf32>
    %99 = vector.extract_strided_slice %36 {offsets = [16, 0], sizes = [8, 32], strides = [1, 1]} : vector<32x32xf32> to vector<8x32xf32>
    %cst_40 = arith.constant dense<0.000000e+00> : vector<8x32xf32>
    %100 = tpu.matmul %98, %99, %cst_40 {dimension_numbers = #tpu.dot_dimension_numbers<[1], [0], [0], [1], [0, 0, 1, 1], [], []>} : vector<8x8xf32>, vector<8x32xf32>, vector<8x32xf32> -> vector<8x32xf32>
    %101 = arith.addf %79, %100 : vector<8x32xf32>
    %102 = vector.extract_strided_slice %34 {offsets = [0, 24], sizes = [8, 8], strides = [1, 1]} : vector<8x96xf32> to vector<8x8xf32>
    %103 = vector.extract_strided_slice %34 {offsets = [0, 56], sizes = [8, 8], strides = [1, 1]} : vector<8x96xf32> to vector<8x8xf32>
    %104 = vector.extract_strided_slice %34 {offsets = [0, 88], sizes = [8, 8], strides = [1, 1]} : vector<8x96xf32> to vector<8x8xf32>
    %cst_41 = arith.constant dense<0.000000e+00> : vector<8x8xf32>
    %105 = tpu.matmul %102, %103, %cst_41 {dimension_numbers = #tpu.dot_dimension_numbers<[1], [1], [0], [0], [0, 0, 1, 0], [], []>} : vector<8x8xf32>, vector<8x8xf32>, vector<8x8xf32> -> vector<8x8xf32>
    %cst_42 = arith.constant 0.353553385 : f32
    %106 = vector.broadcast %cst_42 : f32 to vector<8x8xf32>
    %107 = arith.mulf %105, %106 : vector<8x8xf32>
    %108 = vector.broadcast %1 : vector<1x8xf32> to vector<8x8xf32>
    %109 = arith.addf %107, %108 : vector<8x8xf32>
    %cst_43 = arith.constant dense<0xFF800000> : vector<8xf32>
    %110 = vector.multi_reduction <maximumf>, %109, %cst_43 [1] : vector<8x8xf32> to vector<8xf32>
    %111 = vector.shape_cast %110 : vector<8xf32> to vector<8x1xf32>
    %112 = vector.broadcast %111 : vector<8x1xf32> to vector<8x8xf32>
    %113 = arith.subf %109, %112 : vector<8x8xf32>
    %114 = math.exp %113 : vector<8x8xf32>
    %cst_44 = arith.constant dense<0.000000e+00> : vector<8xf32>
    %115 = vector.multi_reduction <add>, %114, %cst_44 [1] : vector<8x8xf32> to vector<8xf32>
    %116 = vector.shape_cast %115 : vector<8xf32> to vector<8x1xf32>
    %117 = tpu.reciprocal %116 {approx = true} : vector<8x1xf32> -> vector<8x1xf32>
    %118 = vector.broadcast %117 : vector<8x1xf32> to vector<8x8xf32>
    %119 = arith.mulf %114, %118 : vector<8x8xf32>
    %cst_45 = arith.constant dense<0.000000e+00> : vector<8x8xf32>
    %120 = tpu.matmul %119, %104, %cst_45 {dimension_numbers = #tpu.dot_dimension_numbers<[1], [0], [0], [1], [0, 0, 1, 1], [], []>} : vector<8x8xf32>, vector<8x8xf32>, vector<8x8xf32> -> vector<8x8xf32>
    %121 = vector.extract_strided_slice %36 {offsets = [24, 0], sizes = [8, 32], strides = [1, 1]} : vector<32x32xf32> to vector<8x32xf32>
    %cst_46 = arith.constant dense<0.000000e+00> : vector<8x32xf32>
    %122 = tpu.matmul %120, %121, %cst_46 {dimension_numbers = #tpu.dot_dimension_numbers<[1], [0], [0], [1], [0, 0, 1, 1], [], []>} : vector<8x8xf32>, vector<8x32xf32>, vector<8x32xf32> -> vector<8x32xf32>
    %123 = arith.addf %101, %122 : vector<8x32xf32>
    %c0_47 = arith.constant 0 : index
    %c0_48 = arith.constant 0 : index
    %c0_49 = arith.constant 0 : index
    %124 = vector.load %arg8[%c0_47, %c0_48, %c0_49] : memref<2x1x32xf32, #tpu.memory_space<vmem>>, vector<1x1x32xf32>
    %125 = vector.shape_cast %124 : vector<1x1x32xf32> to vector<1x32xf32>
    %126 = vector.broadcast %125 : vector<1x32xf32> to vector<8x32xf32>
    %127 = arith.addf %123, %126 : vector<8x32xf32>
    %128 = arith.addf %127, %27 : vector<8x32xf32>
    %c0_50 = arith.constant 0 : index
    %c0_51 = arith.constant 0 : index
    %c0_52 = arith.constant 0 : index
    %129 = vector.load %arg9[%c0_50, %c0_51, %c0_52] : memref<2x1x32xf32, #tpu.memory_space<vmem>>, vector<1x1x32xf32>
    %130 = vector.shape_cast %129 : vector<1x1x32xf32> to vector<1x32xf32>
    %c0_53 = arith.constant 0 : index
    %c0_54 = arith.constant 0 : index
    %c0_55 = arith.constant 0 : index
    %131 = vector.load %arg10[%c0_53, %c0_54, %c0_55] : memref<2x1x32xf32, #tpu.memory_space<vmem>>, vector<1x1x32xf32>
    %132 = vector.shape_cast %131 : vector<1x1x32xf32> to vector<1x32xf32>
    %cst_56 = arith.constant dense<0.000000e+00> : vector<8xf32>
    %133 = vector.multi_reduction <add>, %128, %cst_56 [1] : vector<8x32xf32> to vector<8xf32>
    %134 = vector.shape_cast %133 : vector<8xf32> to vector<8x1xf32>
    %cst_57 = arith.constant 3.200000e+01 : f32
    %135 = vector.broadcast %cst_57 : f32 to vector<8x1xf32>
    %136 = arith.divf %134, %135 : vector<8x1xf32>
    %137 = vector.broadcast %136 : vector<8x1xf32> to vector<8x32xf32>
    %138 = arith.subf %128, %137 : vector<8x32xf32>
    %139 = arith.mulf %138, %138 : vector<8x32xf32>
    %cst_58 = arith.constant dense<0.000000e+00> : vector<8xf32>
    %140 = vector.multi_reduction <add>, %139, %cst_58 [1] : vector<8x32xf32> to vector<8xf32>
    %141 = vector.shape_cast %140 : vector<8xf32> to vector<8x1xf32>
    %cst_59 = arith.constant 3.200000e+01 : f32
    %142 = vector.broadcast %cst_59 : f32 to vector<8x1xf32>
    %143 = arith.divf %141, %142 : vector<8x1xf32>
    %144 = vector.broadcast %136 : vector<8x1xf32> to vector<8x32xf32>
    %145 = arith.subf %128, %144 : vector<8x32xf32>
    %cst_60 = arith.constant 9.99999996E-13 : f32
    %146 = vector.broadcast %cst_60 : f32 to vector<8x1xf32>
    %147 = arith.addf %143, %146 : vector<8x1xf32>
    %148 = math.rsqrt %147 : vector<8x1xf32>
    %149 = vector.broadcast %148 : vector<8x1xf32> to vector<8x32xf32>
    %150 = arith.mulf %145, %149 : vector<8x32xf32>
    %151 = vector.broadcast %130 : vector<1x32xf32> to vector<8x32xf32>
    %152 = arith.mulf %150, %151 : vector<8x32xf32>
    %153 = vector.broadcast %132 : vector<1x32xf32> to vector<8x32xf32>
    %154 = arith.addf %152, %153 : vector<8x32xf32>
    %c0_61 = arith.constant 0 : index
    %c0_62 = arith.constant 0 : index
    %c0_63 = arith.constant 0 : index
    %155 = vector.load %arg11[%c0_61, %c0_62, %c0_63] : memref<2x32x64xf32, #tpu.memory_space<vmem>>, vector<1x32x64xf32>
    %156 = vector.shape_cast %155 : vector<1x32x64xf32> to vector<32x64xf32>
    %cst_64 = arith.constant dense<0.000000e+00> : vector<8x64xf32>
    %157 = tpu.matmul %154, %156, %cst_64 {dimension_numbers = #tpu.dot_dimension_numbers<[1], [0], [0], [1], [0, 0, 1, 1], [], []>} : vector<8x32xf32>, vector<32x64xf32>, vector<8x64xf32> -> vector<8x64xf32>
    %c0_65 = arith.constant 0 : index
    %c0_66 = arith.constant 0 : index
    %c0_67 = arith.constant 0 : index
    %158 = vector.load %arg12[%c0_65, %c0_66, %c0_67] : memref<2x1x64xf32, #tpu.memory_space<vmem>>, vector<1x1x64xf32>
    %159 = vector.shape_cast %158 : vector<1x1x64xf32> to vector<1x64xf32>
    %160 = vector.broadcast %159 : vector<1x64xf32> to vector<8x64xf32>
    %161 = arith.addf %157, %160 : vector<8x64xf32>
    %cst_68 = arith.constant 5.000000e-01 : f32
    %162 = vector.broadcast %cst_68 : f32 to vector<8x64xf32>
    %163 = arith.mulf %162, %161 : vector<8x64xf32>
    %cst_69 = arith.constant 0.707106769 : f32
    %164 = vector.broadcast %cst_69 : f32 to vector<8x64xf32>
    %165 = arith.mulf %161, %164 : vector<8x64xf32>
    %166 = math.erf %165 : vector<8x64xf32>
    %cst_70 = arith.constant 1.000000e+00 : f32
    %167 = vector.broadcast %cst_70 : f32 to vector<8x64xf32>
    %168 = arith.addf %167, %166 : vector<8x64xf32>
    %169 = arith.mulf %163, %168 : vector<8x64xf32>
    %c0_71 = arith.constant 0 : index
    %c0_72 = arith.constant 0 : index
    %c0_73 = arith.constant 0 : index
    %170 = vector.load %arg13[%c0_71, %c0_72, %c0_73] : memref<2x64x32xf32, #tpu.memory_space<vmem>>, vector<1x64x32xf32>
    %171 = vector.shape_cast %170 : vector<1x64x32xf32> to vector<64x32xf32>
    %cst_74 = arith.constant dense<0.000000e+00> : vector<8x32xf32>
    %172 = tpu.matmul %169, %171, %cst_74 {dimension_numbers = #tpu.dot_dimension_numbers<[1], [0], [0], [1], [0, 0, 1, 1], [], []>} : vector<8x64xf32>, vector<64x32xf32>, vector<8x32xf32> -> vector<8x32xf32>
    %c0_75 = arith.constant 0 : index
    %c0_76 = arith.constant 0 : index
    %c0_77 = arith.constant 0 : index
    %173 = vector.load %arg14[%c0_75, %c0_76, %c0_77] : memref<2x1x32xf32, #tpu.memory_space<vmem>>, vector<1x1x32xf32>
    %174 = vector.shape_cast %173 : vector<1x1x32xf32> to vector<1x32xf32>
    %175 = vector.broadcast %174 : vector<1x32xf32> to vector<8x32xf32>
    %176 = arith.addf %172, %175 : vector<8x32xf32>
    %177 = arith.addf %176, %154 : vector<8x32xf32>
    %c0_78 = arith.constant 0 : index
    %c0_79 = arith.constant 0 : index
    %c0_80 = arith.constant 0 : index
    %178 = vector.load %arg15[%c0_78, %c0_79, %c0_80] : memref<2x1x32xf32, #tpu.memory_space<vmem>>, vector<1x1x32xf32>
    %179 = vector.shape_cast %178 : vector<1x1x32xf32> to vector<1x32xf32>
    %c0_81 = arith.constant 0 : index
    %c0_82 = arith.constant 0 : index
    %c0_83 = arith.constant 0 : index
    %180 = vector.load %arg16[%c0_81, %c0_82, %c0_83] : memref<2x1x32xf32, #tpu.memory_space<vmem>>, vector<1x1x32xf32>
    %181 = vector.shape_cast %180 : vector<1x1x32xf32> to vector<1x32xf32>
    %cst_84 = arith.constant dense<0.000000e+00> : vector<8xf32>
    %182 = vector.multi_reduction <add>, %177, %cst_84 [1] : vector<8x32xf32> to vector<8xf32>
    %183 = vector.shape_cast %182 : vector<8xf32> to vector<8x1xf32>
    %cst_85 = arith.constant 3.200000e+01 : f32
    %184 = vector.broadcast %cst_85 : f32 to vector<8x1xf32>
    %185 = arith.divf %183, %184 : vector<8x1xf32>
    %186 = vector.broadcast %185 : vector<8x1xf32> to vector<8x32xf32>
    %187 = arith.subf %177, %186 : vector<8x32xf32>
    %188 = arith.mulf %187, %187 : vector<8x32xf32>
    %cst_86 = arith.constant dense<0.000000e+00> : vector<8xf32>
    %189 = vector.multi_reduction <add>, %188, %cst_86 [1] : vector<8x32xf32> to vector<8xf32>
    %190 = vector.shape_cast %189 : vector<8xf32> to vector<8x1xf32>
    %cst_87 = arith.constant 3.200000e+01 : f32
    %191 = vector.broadcast %cst_87 : f32 to vector<8x1xf32>
    %192 = arith.divf %190, %191 : vector<8x1xf32>
    %193 = vector.broadcast %185 : vector<8x1xf32> to vector<8x32xf32>
    %194 = arith.subf %177, %193 : vector<8x32xf32>
    %cst_88 = arith.constant 9.99999996E-13 : f32
    %195 = vector.broadcast %cst_88 : f32 to vector<8x1xf32>
    %196 = arith.addf %192, %195 : vector<8x1xf32>
    %197 = math.rsqrt %196 : vector<8x1xf32>
    %198 = vector.broadcast %197 : vector<8x1xf32> to vector<8x32xf32>
    %199 = arith.mulf %194, %198 : vector<8x32xf32>
    %200 = vector.broadcast %179 : vector<1x32xf32> to vector<8x32xf32>
    %201 = arith.mulf %199, %200 : vector<8x32xf32>
    %202 = vector.broadcast %181 : vector<1x32xf32> to vector<8x32xf32>
    %203 = arith.addf %201, %202 : vector<8x32xf32>
    %c1 = arith.constant 1 : index
    %c0_89 = arith.constant 0 : index
    %c0_90 = arith.constant 0 : index
    %204 = vector.load %arg5[%c1, %c0_89, %c0_90] : memref<2x32x96xf32, #tpu.memory_space<vmem>>, vector<1x32x96xf32>
    %205 = vector.shape_cast %204 : vector<1x32x96xf32> to vector<32x96xf32>
    %cst_91 = arith.constant dense<0.000000e+00> : vector<8x96xf32>
    %206 = tpu.matmul %203, %205, %cst_91 {dimension_numbers = #tpu.dot_dimension_numbers<[1], [0], [0], [1], [0, 0, 1, 1], [], []>} : vector<8x32xf32>, vector<32x96xf32>, vector<8x96xf32> -> vector<8x96xf32>
    %c1_92 = arith.constant 1 : index
    %c0_93 = arith.constant 0 : index
    %c0_94 = arith.constant 0 : index
    %207 = vector.load %arg6[%c1_92, %c0_93, %c0_94] : memref<2x1x96xf32, #tpu.memory_space<vmem>>, vector<1x1x96xf32>
    %208 = vector.shape_cast %207 : vector<1x1x96xf32> to vector<1x96xf32>
    %209 = vector.broadcast %208 : vector<1x96xf32> to vector<8x96xf32>
    %210 = arith.addf %206, %209 : vector<8x96xf32>
    %c1_95 = arith.constant 1 : index
    %c0_96 = arith.constant 0 : index
    %c0_97 = arith.constant 0 : index
    %211 = vector.load %arg7[%c1_95, %c0_96, %c0_97] : memref<2x32x32xf32, #tpu.memory_space<vmem>>, vector<1x32x32xf32>
    %212 = vector.shape_cast %211 : vector<1x32x32xf32> to vector<32x32xf32>
    %213 = vector.extract_strided_slice %210 {offsets = [0, 0], sizes = [8, 8], strides = [1, 1]} : vector<8x96xf32> to vector<8x8xf32>
    %214 = vector.extract_strided_slice %210 {offsets = [0, 32], sizes = [8, 8], strides = [1, 1]} : vector<8x96xf32> to vector<8x8xf32>
    %215 = vector.extract_strided_slice %210 {offsets = [0, 64], sizes = [8, 8], strides = [1, 1]} : vector<8x96xf32> to vector<8x8xf32>
    %cst_98 = arith.constant dense<0.000000e+00> : vector<8x8xf32>
    %216 = tpu.matmul %213, %214, %cst_98 {dimension_numbers = #tpu.dot_dimension_numbers<[1], [1], [0], [0], [0, 0, 1, 0], [], []>} : vector<8x8xf32>, vector<8x8xf32>, vector<8x8xf32> -> vector<8x8xf32>
    %cst_99 = arith.constant 0.353553385 : f32
    %217 = vector.broadcast %cst_99 : f32 to vector<8x8xf32>
    %218 = arith.mulf %216, %217 : vector<8x8xf32>
    %219 = vector.broadcast %1 : vector<1x8xf32> to vector<8x8xf32>
    %220 = arith.addf %218, %219 : vector<8x8xf32>
    %cst_100 = arith.constant dense<0xFF800000> : vector<8xf32>
    %221 = vector.multi_reduction <maximumf>, %220, %cst_100 [1] : vector<8x8xf32> to vector<8xf32>
    %222 = vector.shape_cast %221 : vector<8xf32> to vector<8x1xf32>
    %223 = vector.broadcast %222 : vector<8x1xf32> to vector<8x8xf32>
    %224 = arith.subf %220, %223 : vector<8x8xf32>
    %225 = math.exp %224 : vector<8x8xf32>
    %cst_101 = arith.constant dense<0.000000e+00> : vector<8xf32>
    %226 = vector.multi_reduction <add>, %225, %cst_101 [1] : vector<8x8xf32> to vector<8xf32>
    %227 = vector.shape_cast %226 : vector<8xf32> to vector<8x1xf32>
    %228 = tpu.reciprocal %227 {approx = true} : vector<8x1xf32> -> vector<8x1xf32>
    %229 = vector.broadcast %228 : vector<8x1xf32> to vector<8x8xf32>
    %230 = arith.mulf %225, %229 : vector<8x8xf32>
    %cst_102 = arith.constant dense<0.000000e+00> : vector<8x8xf32>
    %231 = tpu.matmul %230, %215, %cst_102 {dimension_numbers = #tpu.dot_dimension_numbers<[1], [0], [0], [1], [0, 0, 1, 1], [], []>} : vector<8x8xf32>, vector<8x8xf32>, vector<8x8xf32> -> vector<8x8xf32>
    %232 = vector.extract_strided_slice %212 {offsets = [0, 0], sizes = [8, 32], strides = [1, 1]} : vector<32x32xf32> to vector<8x32xf32>
    %cst_103 = arith.constant dense<0.000000e+00> : vector<8x32xf32>
    %233 = tpu.matmul %231, %232, %cst_103 {dimension_numbers = #tpu.dot_dimension_numbers<[1], [0], [0], [1], [0, 0, 1, 1], [], []>} : vector<8x8xf32>, vector<8x32xf32>, vector<8x32xf32> -> vector<8x32xf32>
    %234 = vector.extract_strided_slice %210 {offsets = [0, 8], sizes = [8, 8], strides = [1, 1]} : vector<8x96xf32> to vector<8x8xf32>
    %235 = vector.extract_strided_slice %210 {offsets = [0, 40], sizes = [8, 8], strides = [1, 1]} : vector<8x96xf32> to vector<8x8xf32>
    %236 = vector.extract_strided_slice %210 {offsets = [0, 72], sizes = [8, 8], strides = [1, 1]} : vector<8x96xf32> to vector<8x8xf32>
    %cst_104 = arith.constant dense<0.000000e+00> : vector<8x8xf32>
    %237 = tpu.matmul %234, %235, %cst_104 {dimension_numbers = #tpu.dot_dimension_numbers<[1], [1], [0], [0], [0, 0, 1, 0], [], []>} : vector<8x8xf32>, vector<8x8xf32>, vector<8x8xf32> -> vector<8x8xf32>
    %cst_105 = arith.constant 0.353553385 : f32
    %238 = vector.broadcast %cst_105 : f32 to vector<8x8xf32>
    %239 = arith.mulf %237, %238 : vector<8x8xf32>
    %240 = vector.broadcast %1 : vector<1x8xf32> to vector<8x8xf32>
    %241 = arith.addf %239, %240 : vector<8x8xf32>
    %cst_106 = arith.constant dense<0xFF800000> : vector<8xf32>
    %242 = vector.multi_reduction <maximumf>, %241, %cst_106 [1] : vector<8x8xf32> to vector<8xf32>
    %243 = vector.shape_cast %242 : vector<8xf32> to vector<8x1xf32>
    %244 = vector.broadcast %243 : vector<8x1xf32> to vector<8x8xf32>
    %245 = arith.subf %241, %244 : vector<8x8xf32>
    %246 = math.exp %245 : vector<8x8xf32>
    %cst_107 = arith.constant dense<0.000000e+00> : vector<8xf32>
    %247 = vector.multi_reduction <add>, %246, %cst_107 [1] : vector<8x8xf32> to vector<8xf32>
    %248 = vector.shape_cast %247 : vector<8xf32> to vector<8x1xf32>
    %249 = tpu.reciprocal %248 {approx = true} : vector<8x1xf32> -> vector<8x1xf32>
    %250 = vector.broadcast %249 : vector<8x1xf32> to vector<8x8xf32>
    %251 = arith.mulf %246, %250 : vector<8x8xf32>
    %cst_108 = arith.constant dense<0.000000e+00> : vector<8x8xf32>
    %252 = tpu.matmul %251, %236, %cst_108 {dimension_numbers = #tpu.dot_dimension_numbers<[1], [0], [0], [1], [0, 0, 1, 1], [], []>} : vector<8x8xf32>, vector<8x8xf32>, vector<8x8xf32> -> vector<8x8xf32>
    %253 = vector.extract_strided_slice %212 {offsets = [8, 0], sizes = [8, 32], strides = [1, 1]} : vector<32x32xf32> to vector<8x32xf32>
    %cst_109 = arith.constant dense<0.000000e+00> : vector<8x32xf32>
    %254 = tpu.matmul %252, %253, %cst_109 {dimension_numbers = #tpu.dot_dimension_numbers<[1], [0], [0], [1], [0, 0, 1, 1], [], []>} : vector<8x8xf32>, vector<8x32xf32>, vector<8x32xf32> -> vector<8x32xf32>
    %255 = arith.addf %233, %254 : vector<8x32xf32>
    %256 = vector.extract_strided_slice %210 {offsets = [0, 16], sizes = [8, 8], strides = [1, 1]} : vector<8x96xf32> to vector<8x8xf32>
    %257 = vector.extract_strided_slice %210 {offsets = [0, 48], sizes = [8, 8], strides = [1, 1]} : vector<8x96xf32> to vector<8x8xf32>
    %258 = vector.extract_strided_slice %210 {offsets = [0, 80], sizes = [8, 8], strides = [1, 1]} : vector<8x96xf32> to vector<8x8xf32>
    %cst_110 = arith.constant dense<0.000000e+00> : vector<8x8xf32>
    %259 = tpu.matmul %256, %257, %cst_110 {dimension_numbers = #tpu.dot_dimension_numbers<[1], [1], [0], [0], [0, 0, 1, 0], [], []>} : vector<8x8xf32>, vector<8x8xf32>, vector<8x8xf32> -> vector<8x8xf32>
    %cst_111 = arith.constant 0.353553385 : f32
    %260 = vector.broadcast %cst_111 : f32 to vector<8x8xf32>
    %261 = arith.mulf %259, %260 : vector<8x8xf32>
    %262 = vector.broadcast %1 : vector<1x8xf32> to vector<8x8xf32>
    %263 = arith.addf %261, %262 : vector<8x8xf32>
    %cst_112 = arith.constant dense<0xFF800000> : vector<8xf32>
    %264 = vector.multi_reduction <maximumf>, %263, %cst_112 [1] : vector<8x8xf32> to vector<8xf32>
    %265 = vector.shape_cast %264 : vector<8xf32> to vector<8x1xf32>
    %266 = vector.broadcast %265 : vector<8x1xf32> to vector<8x8xf32>
    %267 = arith.subf %263, %266 : vector<8x8xf32>
    %268 = math.exp %267 : vector<8x8xf32>
    %cst_113 = arith.constant dense<0.000000e+00> : vector<8xf32>
    %269 = vector.multi_reduction <add>, %268, %cst_113 [1] : vector<8x8xf32> to vector<8xf32>
    %270 = vector.shape_cast %269 : vector<8xf32> to vector<8x1xf32>
    %271 = tpu.reciprocal %270 {approx = true} : vector<8x1xf32> -> vector<8x1xf32>
    %272 = vector.broadcast %271 : vector<8x1xf32> to vector<8x8xf32>
    %273 = arith.mulf %268, %272 : vector<8x8xf32>
    %cst_114 = arith.constant dense<0.000000e+00> : vector<8x8xf32>
    %274 = tpu.matmul %273, %258, %cst_114 {dimension_numbers = #tpu.dot_dimension_numbers<[1], [0], [0], [1], [0, 0, 1, 1], [], []>} : vector<8x8xf32>, vector<8x8xf32>, vector<8x8xf32> -> vector<8x8xf32>
    %275 = vector.extract_strided_slice %212 {offsets = [16, 0], sizes = [8, 32], strides = [1, 1]} : vector<32x32xf32> to vector<8x32xf32>
    %cst_115 = arith.constant dense<0.000000e+00> : vector<8x32xf32>
    %276 = tpu.matmul %274, %275, %cst_115 {dimension_numbers = #tpu.dot_dimension_numbers<[1], [0], [0], [1], [0, 0, 1, 1], [], []>} : vector<8x8xf32>, vector<8x32xf32>, vector<8x32xf32> -> vector<8x32xf32>
    %277 = arith.addf %255, %276 : vector<8x32xf32>
    %278 = vector.extract_strided_slice %210 {offsets = [0, 24], sizes = [8, 8], strides = [1, 1]} : vector<8x96xf32> to vector<8x8xf32>
    %279 = vector.extract_strided_slice %210 {offsets = [0, 56], sizes = [8, 8], strides = [1, 1]} : vector<8x96xf32> to vector<8x8xf32>
    %280 = vector.extract_strided_slice %210 {offsets = [0, 88], sizes = [8, 8], strides = [1, 1]} : vector<8x96xf32> to vector<8x8xf32>
    %cst_116 = arith.constant dense<0.000000e+00> : vector<8x8xf32>
    %281 = tpu.matmul %278, %279, %cst_116 {dimension_numbers = #tpu.dot_dimension_numbers<[1], [1], [0], [0], [0, 0, 1, 0], [], []>} : vector<8x8xf32>, vector<8x8xf32>, vector<8x8xf32> -> vector<8x8xf32>
    %cst_117 = arith.constant 0.353553385 : f32
    %282 = vector.broadcast %cst_117 : f32 to vector<8x8xf32>
    %283 = arith.mulf %281, %282 : vector<8x8xf32>
    %284 = vector.broadcast %1 : vector<1x8xf32> to vector<8x8xf32>
    %285 = arith.addf %283, %284 : vector<8x8xf32>
    %cst_118 = arith.constant dense<0xFF800000> : vector<8xf32>
    %286 = vector.multi_reduction <maximumf>, %285, %cst_118 [1] : vector<8x8xf32> to vector<8xf32>
    %287 = vector.shape_cast %286 : vector<8xf32> to vector<8x1xf32>
    %288 = vector.broadcast %287 : vector<8x1xf32> to vector<8x8xf32>
    %289 = arith.subf %285, %288 : vector<8x8xf32>
    %290 = math.exp %289 : vector<8x8xf32>
    %cst_119 = arith.constant dense<0.000000e+00> : vector<8xf32>
    %291 = vector.multi_reduction <add>, %290, %cst_119 [1] : vector<8x8xf32> to vector<8xf32>
    %292 = vector.shape_cast %291 : vector<8xf32> to vector<8x1xf32>
    %293 = tpu.reciprocal %292 {approx = true} : vector<8x1xf32> -> vector<8x1xf32>
    %294 = vector.broadcast %293 : vector<8x1xf32> to vector<8x8xf32>
    %295 = arith.mulf %290, %294 : vector<8x8xf32>
    %cst_120 = arith.constant dense<0.000000e+00> : vector<8x8xf32>
    %296 = tpu.matmul %295, %280, %cst_120 {dimension_numbers = #tpu.dot_dimension_numbers<[1], [0], [0], [1], [0, 0, 1, 1], [], []>} : vector<8x8xf32>, vector<8x8xf32>, vector<8x8xf32> -> vector<8x8xf32>
    %297 = vector.extract_strided_slice %212 {offsets = [24, 0], sizes = [8, 32], strides = [1, 1]} : vector<32x32xf32> to vector<8x32xf32>
    %cst_121 = arith.constant dense<0.000000e+00> : vector<8x32xf32>
    %298 = tpu.matmul %296, %297, %cst_121 {dimension_numbers = #tpu.dot_dimension_numbers<[1], [0], [0], [1], [0, 0, 1, 1], [], []>} : vector<8x8xf32>, vector<8x32xf32>, vector<8x32xf32> -> vector<8x32xf32>
    %299 = arith.addf %277, %298 : vector<8x32xf32>
    %c1_122 = arith.constant 1 : index
    %c0_123 = arith.constant 0 : index
    %c0_124 = arith.constant 0 : index
    %300 = vector.load %arg8[%c1_122, %c0_123, %c0_124] : memref<2x1x32xf32, #tpu.memory_space<vmem>>, vector<1x1x32xf32>
    %301 = vector.shape_cast %300 : vector<1x1x32xf32> to vector<1x32xf32>
    %302 = vector.broadcast %301 : vector<1x32xf32> to vector<8x32xf32>
    %303 = arith.addf %299, %302 : vector<8x32xf32>
    %304 = arith.addf %303, %203 : vector<8x32xf32>
    %c1_125 = arith.constant 1 : index
    %c0_126 = arith.constant 0 : index
    %c0_127 = arith.constant 0 : index
    %305 = vector.load %arg9[%c1_125, %c0_126, %c0_127] : memref<2x1x32xf32, #tpu.memory_space<vmem>>, vector<1x1x32xf32>
    %306 = vector.shape_cast %305 : vector<1x1x32xf32> to vector<1x32xf32>
    %c1_128 = arith.constant 1 : index
    %c0_129 = arith.constant 0 : index
    %c0_130 = arith.constant 0 : index
    %307 = vector.load %arg10[%c1_128, %c0_129, %c0_130] : memref<2x1x32xf32, #tpu.memory_space<vmem>>, vector<1x1x32xf32>
    %308 = vector.shape_cast %307 : vector<1x1x32xf32> to vector<1x32xf32>
    %cst_131 = arith.constant dense<0.000000e+00> : vector<8xf32>
    %309 = vector.multi_reduction <add>, %304, %cst_131 [1] : vector<8x32xf32> to vector<8xf32>
    %310 = vector.shape_cast %309 : vector<8xf32> to vector<8x1xf32>
    %cst_132 = arith.constant 3.200000e+01 : f32
    %311 = vector.broadcast %cst_132 : f32 to vector<8x1xf32>
    %312 = arith.divf %310, %311 : vector<8x1xf32>
    %313 = vector.broadcast %312 : vector<8x1xf32> to vector<8x32xf32>
    %314 = arith.subf %304, %313 : vector<8x32xf32>
    %315 = arith.mulf %314, %314 : vector<8x32xf32>
    %cst_133 = arith.constant dense<0.000000e+00> : vector<8xf32>
    %316 = vector.multi_reduction <add>, %315, %cst_133 [1] : vector<8x32xf32> to vector<8xf32>
    %317 = vector.shape_cast %316 : vector<8xf32> to vector<8x1xf32>
    %cst_134 = arith.constant 3.200000e+01 : f32
    %318 = vector.broadcast %cst_134 : f32 to vector<8x1xf32>
    %319 = arith.divf %317, %318 : vector<8x1xf32>
    %320 = vector.broadcast %312 : vector<8x1xf32> to vector<8x32xf32>
    %321 = arith.subf %304, %320 : vector<8x32xf32>
    %cst_135 = arith.constant 9.99999996E-13 : f32
    %322 = vector.broadcast %cst_135 : f32 to vector<8x1xf32>
    %323 = arith.addf %319, %322 : vector<8x1xf32>
    %324 = math.rsqrt %323 : vector<8x1xf32>
    %325 = vector.broadcast %324 : vector<8x1xf32> to vector<8x32xf32>
    %326 = arith.mulf %321, %325 : vector<8x32xf32>
    %327 = vector.broadcast %306 : vector<1x32xf32> to vector<8x32xf32>
    %328 = arith.mulf %326, %327 : vector<8x32xf32>
    %329 = vector.broadcast %308 : vector<1x32xf32> to vector<8x32xf32>
    %330 = arith.addf %328, %329 : vector<8x32xf32>
    %c1_136 = arith.constant 1 : index
    %c0_137 = arith.constant 0 : index
    %c0_138 = arith.constant 0 : index
    %331 = vector.load %arg11[%c1_136, %c0_137, %c0_138] : memref<2x32x64xf32, #tpu.memory_space<vmem>>, vector<1x32x64xf32>
    %332 = vector.shape_cast %331 : vector<1x32x64xf32> to vector<32x64xf32>
    %cst_139 = arith.constant dense<0.000000e+00> : vector<8x64xf32>
    %333 = tpu.matmul %330, %332, %cst_139 {dimension_numbers = #tpu.dot_dimension_numbers<[1], [0], [0], [1], [0, 0, 1, 1], [], []>} : vector<8x32xf32>, vector<32x64xf32>, vector<8x64xf32> -> vector<8x64xf32>
    %c1_140 = arith.constant 1 : index
    %c0_141 = arith.constant 0 : index
    %c0_142 = arith.constant 0 : index
    %334 = vector.load %arg12[%c1_140, %c0_141, %c0_142] : memref<2x1x64xf32, #tpu.memory_space<vmem>>, vector<1x1x64xf32>
    %335 = vector.shape_cast %334 : vector<1x1x64xf32> to vector<1x64xf32>
    %336 = vector.broadcast %335 : vector<1x64xf32> to vector<8x64xf32>
    %337 = arith.addf %333, %336 : vector<8x64xf32>
    %cst_143 = arith.constant 5.000000e-01 : f32
    %338 = vector.broadcast %cst_143 : f32 to vector<8x64xf32>
    %339 = arith.mulf %338, %337 : vector<8x64xf32>
    %cst_144 = arith.constant 0.707106769 : f32
    %340 = vector.broadcast %cst_144 : f32 to vector<8x64xf32>
    %341 = arith.mulf %337, %340 : vector<8x64xf32>
    %342 = math.erf %341 : vector<8x64xf32>
    %cst_145 = arith.constant 1.000000e+00 : f32
    %343 = vector.broadcast %cst_145 : f32 to vector<8x64xf32>
    %344 = arith.addf %343, %342 : vector<8x64xf32>
    %345 = arith.mulf %339, %344 : vector<8x64xf32>
    %c1_146 = arith.constant 1 : index
    %c0_147 = arith.constant 0 : index
    %c0_148 = arith.constant 0 : index
    %346 = vector.load %arg13[%c1_146, %c0_147, %c0_148] : memref<2x64x32xf32, #tpu.memory_space<vmem>>, vector<1x64x32xf32>
    %347 = vector.shape_cast %346 : vector<1x64x32xf32> to vector<64x32xf32>
    %cst_149 = arith.constant dense<0.000000e+00> : vector<8x32xf32>
    %348 = tpu.matmul %345, %347, %cst_149 {dimension_numbers = #tpu.dot_dimension_numbers<[1], [0], [0], [1], [0, 0, 1, 1], [], []>} : vector<8x64xf32>, vector<64x32xf32>, vector<8x32xf32> -> vector<8x32xf32>
    %c1_150 = arith.constant 1 : index
    %c0_151 = arith.constant 0 : index
    %c0_152 = arith.constant 0 : index
    %349 = vector.load %arg14[%c1_150, %c0_151, %c0_152] : memref<2x1x32xf32, #tpu.memory_space<vmem>>, vector<1x1x32xf32>
    %350 = vector.shape_cast %349 : vector<1x1x32xf32> to vector<1x32xf32>
    %351 = vector.broadcast %350 : vector<1x32xf32> to vector<8x32xf32>
    %352 = arith.addf %348, %351 : vector<8x32xf32>
    %353 = arith.addf %352, %330 : vector<8x32xf32>
    %c1_153 = arith.constant 1 : index
    %c0_154 = arith.constant 0 : index
    %c0_155 = arith.constant 0 : index
    %354 = vector.load %arg15[%c1_153, %c0_154, %c0_155] : memref<2x1x32xf32, #tpu.memory_space<vmem>>, vector<1x1x32xf32>
    %355 = vector.shape_cast %354 : vector<1x1x32xf32> to vector<1x32xf32>
    %c1_156 = arith.constant 1 : index
    %c0_157 = arith.constant 0 : index
    %c0_158 = arith.constant 0 : index
    %356 = vector.load %arg16[%c1_156, %c0_157, %c0_158] : memref<2x1x32xf32, #tpu.memory_space<vmem>>, vector<1x1x32xf32>
    %357 = vector.shape_cast %356 : vector<1x1x32xf32> to vector<1x32xf32>
    %cst_159 = arith.constant dense<0.000000e+00> : vector<8xf32>
    %358 = vector.multi_reduction <add>, %353, %cst_159 [1] : vector<8x32xf32> to vector<8xf32>
    %359 = vector.shape_cast %358 : vector<8xf32> to vector<8x1xf32>
    %cst_160 = arith.constant 3.200000e+01 : f32
    %360 = vector.broadcast %cst_160 : f32 to vector<8x1xf32>
    %361 = arith.divf %359, %360 : vector<8x1xf32>
    %362 = vector.broadcast %361 : vector<8x1xf32> to vector<8x32xf32>
    %363 = arith.subf %353, %362 : vector<8x32xf32>
    %364 = arith.mulf %363, %363 : vector<8x32xf32>
    %cst_161 = arith.constant dense<0.000000e+00> : vector<8xf32>
    %365 = vector.multi_reduction <add>, %364, %cst_161 [1] : vector<8x32xf32> to vector<8xf32>
    %366 = vector.shape_cast %365 : vector<8xf32> to vector<8x1xf32>
    %cst_162 = arith.constant 3.200000e+01 : f32
    %367 = vector.broadcast %cst_162 : f32 to vector<8x1xf32>
    %368 = arith.divf %366, %367 : vector<8x1xf32>
    %369 = vector.broadcast %361 : vector<8x1xf32> to vector<8x32xf32>
    %370 = arith.subf %353, %369 : vector<8x32xf32>
    %cst_163 = arith.constant 9.99999996E-13 : f32
    %371 = vector.broadcast %cst_163 : f32 to vector<8x1xf32>
    %372 = arith.addf %368, %371 : vector<8x1xf32>
    %373 = math.rsqrt %372 : vector<8x1xf32>
    %374 = vector.broadcast %373 : vector<8x1xf32> to vector<8x32xf32>
    %375 = arith.mulf %370, %374 : vector<8x32xf32>
    %376 = vector.broadcast %355 : vector<1x32xf32> to vector<8x32xf32>
    %377 = arith.mulf %375, %376 : vector<8x32xf32>
    %378 = vector.broadcast %357 : vector<1x32xf32> to vector<8x32xf32>
    %379 = arith.addf %377, %378 : vector<8x32xf32>
    %380 = vector.extract_strided_slice %379 {offsets = [0, 0], sizes = [1, 32], strides = [1, 1]} : vector<8x32xf32> to vector<1x32xf32>
    %c0_164 = arith.constant 0 : index
    %c0_165 = arith.constant 0 : index
    %c0_166 = arith.constant 0 : index
    %381 = vector.load %arg17[%c0_164, %c0_165, %c0_166] : memref<1x1x32xf32, #tpu.memory_space<vmem>>, vector<1x1x32xf32>
    %382 = vector.shape_cast %381 : vector<1x1x32xf32> to vector<1x32xf32>
    %383 = vector.shape_cast %380 : vector<1x32xf32> to vector<1x1x32xf32>
    tpu.vector_store %arg17[%c0_164, %c0_165, %c0_166], %383 {strides = array<i32>} : memref<1x1x32xf32, #tpu.memory_space<vmem>>, vector<1x1x32xf32>,
    return
  }
  func.func @transform_0(%arg0: i32) -> (i32, i32, i32) {
    %c0_i32 = arith.constant 0 : i32
    %c0_i32_0 = arith.constant 0 : i32
    %c0_i32_1 = arith.constant 0 : i32
    return %arg0, %c0_i32, %c0_i32_0 : i32, i32, i32
  }
  func.func @transform_1(%arg0: i32) -> (i32, i32, i32) {
    %c0_i32 = arith.constant 0 : i32
    %c0_i32_0 = arith.constant 0 : i32
    %c0_i32_1 = arith.constant 0 : i32
    return %arg0, %c0_i32, %c0_i32_0 : i32, i32, i32
  }
  func.func @transform_2(%arg0: i32) -> (i32, i32) {
    %c0_i32 = arith.constant 0 : i32
    %c0_i32_0 = arith.constant 0 : i32
    %c0_i32_1 = arith.constant 0 : i32
    return %c0_i32, %c0_i32_0 : i32, i32
  }
  func.func @transform_3(%arg0: i32) -> (i32, i32) {
    %c0_i32 = arith.constant 0 : i32
    %c0_i32_0 = arith.constant 0 : i32
    %c0_i32_1 = arith.constant 0 : i32
    return %c0_i32, %c0_i32_0 : i32, i32
  }
  func.func @transform_4(%arg0: i32) -> (i32, i32, i32) {
    %c0_i32 = arith.constant 0 : i32
    %c0_i32_0 = arith.constant 0 : i32
    %c0_i32_1 = arith.constant 0 : i32
    %c0_i32_2 = arith.constant 0 : i32
    return %c0_i32, %c0_i32_0, %c0_i32_1 : i32, i32, i32
  }
  func.func @transform_5(%arg0: i32) -> (i32, i32, i32) {
    %c0_i32 = arith.constant 0 : i32
    %c0_i32_0 = arith.constant 0 : i32
    %c0_i32_1 = arith.constant 0 : i32
    %c0_i32_2 = arith.constant 0 : i32
    return %c0_i32, %c0_i32_0, %c0_i32_1 : i32, i32, i32
  }
  func.func @transform_6(%arg0: i32) -> (i32, i32, i32) {
    %c0_i32 = arith.constant 0 : i32
    %c0_i32_0 = arith.constant 0 : i32
    %c0_i32_1 = arith.constant 0 : i32
    %c0_i32_2 = arith.constant 0 : i32
    return %c0_i32, %c0_i32_0, %c0_i32_1 : i32, i32, i32
  }
  func.func @transform_7(%arg0: i32) -> (i32, i32, i32) {
    %c0_i32 = arith.constant 0 : i32
    %c0_i32_0 = arith.constant 0 : i32
    %c0_i32_1 = arith.constant 0 : i32
    %c0_i32_2 = arith.constant 0 : i32
    return %c0_i32, %c0_i32_0, %c0_i32_1 : i32, i32, i32
  }
  func.func @transform_8(%arg0: i32) -> (i32, i32, i32) {
    %c0_i32 = arith.constant 0 : i32
    %c0_i32_0 = arith.constant 0 : i32
    %c0_i32_1 = arith.constant 0 : i32
    %c0_i32_2 = arith.constant 0 : i32
    return %c0_i32, %c0_i32_0, %c0_i32_1 : i32, i32, i32
  }
  func.func @transform_9(%arg0: i32) -> (i32, i32, i32) {
    %c0_i32 = arith.constant 0 : i32
    %c0_i32_0 = arith.constant 0 : i32
    %c0_i32_1 = arith.constant 0 : i32
    %c0_i32_2 = arith.constant 0 : i32
    return %c0_i32, %c0_i32_0, %c0_i32_1 : i32, i32, i32
  }
  func.func @transform_10(%arg0: i32) -> (i32, i32, i32) {
    %c0_i32 = arith.constant 0 : i32
    %c0_i32_0 = arith.constant 0 : i32
    %c0_i32_1 = arith.constant 0 : i32
    %c0_i32_2 = arith.constant 0 : i32
    return %c0_i32, %c0_i32_0, %c0_i32_1 : i32, i32, i32
  }
  func.func @transform_11(%arg0: i32) -> (i32, i32, i32) {
    %c0_i32 = arith.constant 0 : i32
    %c0_i32_0 = arith.constant 0 : i32
    %c0_i32_1 = arith.constant 0 : i32
    %c0_i32_2 = arith.constant 0 : i32
    return %c0_i32, %c0_i32_0, %c0_i32_1 : i32, i32, i32
  }
  func.func @transform_12(%arg0: i32) -> (i32, i32, i32) {
    %c0_i32 = arith.constant 0 : i32
    %c0_i32_0 = arith.constant 0 : i32
    %c0_i32_1 = arith.constant 0 : i32
    %c0_i32_2 = arith.constant 0 : i32
    return %c0_i32, %c0_i32_0, %c0_i32_1 : i32, i32, i32
  }
  func.func @transform_13(%arg0: i32) -> (i32, i32, i32) {
    %c0_i32 = arith.constant 0 : i32
    %c0_i32_0 = arith.constant 0 : i32
    %c0_i32_1 = arith.constant 0 : i32
    %c0_i32_2 = arith.constant 0 : i32
    return %c0_i32, %c0_i32_0, %c0_i32_1 : i32, i32, i32
  }
  func.func @transform_14(%arg0: i32) -> (i32, i32, i32) {
    %c0_i32 = arith.constant 0 : i32
    %c0_i32_0 = arith.constant 0 : i32
    %c0_i32_1 = arith.constant 0 : i32
    %c0_i32_2 = arith.constant 0 : i32
    return %c0_i32, %c0_i32_0, %c0_i32_1 : i32, i32, i32
  }
  func.func @transform_15(%arg0: i32) -> (i32, i32, i32) {
    %c0_i32 = arith.constant 0 : i32
    %c0_i32_0 = arith.constant 0 : i32
    %c0_i32_1 = arith.constant 0 : i32
    %c0_i32_2 = arith.constant 0 : i32
    return %c0_i32, %c0_i32_0, %c0_i32_1 : i32, i32, i32
  }
  func.func @transform_16(%arg0: i32) -> (i32, i32, i32) {
    %c0_i32 = arith.constant 0 : i32
    %c0_i32_0 = arith.constant 0 : i32
    %c0_i32_1 = arith.constant 0 : i32
    return %arg0, %c0_i32, %c0_i32_0 : i32, i32, i32
  }
}

</mosaic_0001>

<bundles_post_ra>
// kernel: bert_encoder_forward.1
= control target key start
LH: loop header
LB: loop body
LE: loop exit
PB: predicated region body
PF: predicated region fallthrough
CT: control target
= control target key end

     0   :  { %s4455_s0 = inlined_call_operand.vmem [shape: f32[2,8,32], index: 0, kind: input, shape index: {}]   ;;  %s4456_s1 = inlined_call_operand.vmem [shape: f32[2,1,8], index: 1, kind: input, shape index: {}]   ;;  %s4457_s2 = inlined_call_operand.vmem [shape: f32[1,32], index: 2, kind: input, shape index: {}]   ;;  %s4458_s3 = inlined_call_operand.vmem [shape: f32[1,32], index: 3, kind: input, shape index: {}]   ;;  %s4459_s4 = inlined_call_operand.vmem [shape: f32[2,32,96], index: 4, kind: input, shape index: {}]   ;;  %s4460_s5 = inlined_call_operand.vmem [shape: f32[2,1,96], index: 5, kind: input, shape index: {}]   ;;  %s4461_s6 = inlined_call_operand.vmem [shape: f32[2,32,32], index: 6, kind: input, shape index: {}]   ;;  %s4462_s7 = inlined_call_operand.vmem [shape: f32[2,1,32], index: 7, kind: input, shape index: {}]   ;;  %s4463_s8 = inlined_call_operand.vmem [shape: f32[2,1,32], index: 8, kind: input, shape index: {}]   ;;  %s4464_s9 = inlined_call_operand.vmem [shape: f32[2,1,32], index: 9, kind: input, shape index: {}]   ;;  %s4465_s10 = inlined_call_operand.vmem [shape: f32[2,32,64], index: 10, kind: input, shape index: {}]   ;;  %s4466_s11 = inlined_call_operand.vmem [shape: f32[2,1,64], index: 11, kind: input, shape index: {}]   ;;  %s4467_s12 = inlined_call_operand.vmem [shape: f32[2,64,32], index: 12, kind: input, shape index: {}]   ;;  %s4468_s13 = inlined_call_operand.vmem [shape: f32[2,1,32], index: 13, kind: input, shape index: {}]   ;;  %s4469_s14 = inlined_call_operand.vmem [shape: f32[2,1,32], index: 14, kind: input, shape index: {}]   ;;  %s4470_s15 = inlined_call_operand.vmem [shape: f32[2,1,32], index: 15, kind: input, shape index: {}]   ;;  %s4471_s16 = inlined_call_operand.hbm [shape: f32[2,1,32], index: 16, kind: output, shape index: {}]  }
   0x1   :  { %4485 = sst [smem:[#allocation9_spill]] %s4455_s0 }
   0x2   :  { %4486 = sst [smem:[#allocation10_spill]] %s4456_s1 }
   0x3   :  { %21 = vsyncpa [#allocation3], 0 }
   0x4   :  { %23 = vsyncpa [#allocation3 + $0x1], 0  ;;  %s3942_s21 = smov 0   ;;  %s3944_s22 = smov 0  }
   0x5   :  { %s3946_s23 = smov 0   ;;  %s3948_s24 = smov 0  }
   0x6 LB: > { %4487 = sst [smem:[#allocation5_spill]] %s3836_s23  ;;  %s3963_s25 = sadd.s32 4294967295, %s3840_s24   ;;  %s3840_s24 = sphi %s3948_s24, %s4505_s24   ;;  %s3836_s23 = sphi %s3946_s23, %s4507_s23   ;;  %s3832_s22 = sphi %s3944_s22, %s4509_s22   ;;  %s3828_s21 = sphi %s3942_s21, %s4508_s21  }
   0x7   : > { %s3250_s26 = sadd.s32 4294967294, %s3840_s24   ;;  %s3967_s27 = sadd.s32 1, %s3840_s24  }
   0x8   : > { %4488 = sst [smem:[#allocation6_spill]] %s3967_s27  ;;  %s382_s28 = sadd.s32 1, %s3836_s23 }
   0x9   : > { %s379_s29 = ssub.s32 %s3840_s24, %s3967_s27  ;;  %p392_p0 = scmp.ne.s32.totalorder %s3836_s23, %s3832_s22 }
   0xa   : > { %p380_p1 = scmp.eq.s32.totalorder %s379_s29, 0  ;;  %p393_p2 = scmp.eq.s32.totalorder %s3963_s25, 1 }
   0xb   : > { %p398_p3 = scmp.ne.s32.totalorder %s3832_s22, %s3828_s21  ;;  %p399_p4 = scmp.eq.s32.totalorder %s3250_s26, 1 }
   0xc   : > { %s3978_s30 = scalar_select %p380_p1, %s3836_s23, %s382_s28  }
   0xd   : > { %p3980_p5 = por %p393_p2, %p392_p0  ;;  %p3984_p6 = por %p399_p4, %p398_p3 }
   0xe   : > { %4489 = sst [smem:[#allocation7_spill]] %s3978_s30  ;;  %p3253_p7 = scmp.ge.s32.totalorder %s3840_s24, 1 }
   0xf   : > { %s4491_s17 = scalar_select %p3984_p6, 1, 0 }
  0x10   : > { %p472_p8 = scmp.lt.s32.totalorder %s3840_s24, 3 }
  0x11   : > { %4492 = sst [smem:[#allocation8_spill]] %s4491_s17 }
  0x12   : > { %p473_p9 = pnand %p3253_p7, %p472_p8 }
  0x13   : > { %p523_p10 = scmp.lt.s32.totalorder (!%p473_p9), %s3963_s25, 1  ;;  %vm534_vm0 = vcmask (!%p473_p9), 261120   ;;  %s4493_s28 = sld [smem:[#allocation9_spill]] (!%p473_p9)  ;;  %v563_v7 = vld [vmem:[%s4459_s4] sm:$0xff] (!%p473_p9)  ;;  %v564_v8 = vld [vmem:[%s4459_s4 + $0x8] sm:$0xff] (!%p473_p9)  ;;  %v565_v9 = vld [vmem:[%s4459_s4 + $0x10] sm:$0xff] (!%p473_p9) }
  0x14   : > { %476 = sbr.rel (%p473_p9) target bundleno = 7657 (0x1de9), region = 84  ;;  %v3842_v10 = vmov (!%p473_p9), 0.0|0.0   ;;  %v3632_v11 = vpack.c.bf16 (!%p473_p9), %v564_v8, %v563_v7  ;;  %v566_v12 = vld [vmem:[%s4459_s4 + $0x18] sm:$0xff] (!%p473_p9)  ;;  %vm3843_vm1 = vmmov (!%p473_p9), 0   ;;  %v3844_v13 = vmov (!%p473_p9), 0.0   ;;  %s4484_s20 = smov (!%p473_p9), 120  }
  0x15   : > { %3631 = vmatprep.subr.bf16.mxu0 (!%p473_p9), %v3842_v10  ;;  %3437 = vmatprep.mubr.msk.f32.mxu0 (!%p473_p9), %vm3843_vm1, %v3844_v13  ;;  %v3635_v14 = vpack.c.bf16 (!%p473_p9), %v566_v12, %v565_v9  ;;  %v3255_v19 = vld [vmem:[%s4457_s2] ss:$0 sm:$0xff] (!%p473_p9)  ;;  %s3846_s26 = smov (!%p473_p9), 96   ;;  %vm654_vm2 = vcmask (!%p473_p9), 64512   ;;  %s4494_s1 = sld [smem:[#allocation10_spill]] (!%p473_p9)  ;;  %v648_v52 = vld [vmem:[%s4461_s6 + $0x8] sm:$0xff] (!%p473_p9) }
  0x16   : > { %3445 = vmatprep.subr.mxu1 (!%p473_p9), %v3844_v13  ;;  %3447 = vmatprep.mubr.msk.f32.mxu1 (!%p473_p9), %vm3843_vm1, %v3844_v13  ;;  %v3256_v21 = vld [vmem:[%s4458_s3] ss:$0 sm:$0xff] (!%p473_p9)  ;;  %s4483_s17 = smov (!%p473_p9), 56   ;;  %s4476_s27 = smov (!%p473_p9), 48   ;;  %vm1761_vm3 = vcmask (!%p473_p9), 523264   ;;  %vm3171_vm4 = vcmask (!%p473_p9), 253952  }
  0x17   : > { %3633 = vmatpush3.bf16.msra.mxu0 (!%p473_p9), %v3632_v11  ;;  %v3257_v24 = vld [vmem:[%s4460_s5] ss:$0 sm:$0xff] (!%p473_p9)  ;;  %s4478_s23 = smov (!%p473_p9), 72  }
  0x18   : > { %3634 = vmatprep.subr.bf16.mxu0 (!%p473_p9), %v3842_v10  ;;  %v647_v61 = vld [vmem:[%s4461_s6] sm:$0xff] (!%p473_p9) }
  0x1b   : > { %s3992_s18 = scalar_select %p523_p10, %s3963_s25, 1  ;;  %3636 = vmatpush3.bf16.msra.mxu0 %v3635_v14 }
  0x1c   : > { %3440 = vmatprep.subr.mxu0 %v3844_v13 }
  0x1d   : > { %s3254_s19 = sshll.u32 %s3992_s18, 3  ;;  %s529_s30 = scalar_lea.vmem %s4494_s1, %s3992_s18 }
  0x1e   : > { %s526_s29 = scalar_lea.vmem %s4493_s28, %s3254_s19  ;;  %s3847_s28 = smov 88   ;;  %v4058_v31 = vld [vmem:[%s529_s30] ss:$0 sm:$0xff] }
  0x1f   : > { %v531_v0 = vld [vmem:[%s526_s29] sm:$0xff]  ;;  %s4481_s18 = smov 64   ;;  %s4482_s29 = smov 80  }
  0x20   : > { %v535_v1 = vsel %vm534_vm0, %v531_v0, 0.0  ;;  %s4480_s19 = smov 112   ;;  %s4477_s30 = smov 104  }
  0x21   : > { %536 = vadd.xlane.f32.xlu0 %v535_v1 }
  0xae   : > { %v537_v2 = vpop.xlane.xlu0 %536 }
  0xaf   : > { %v539_v3 = vmul.f32 0.03125, %v537_v2 }
  0xb1   : > { %v540_v4 = vsub.f32 %v531_v0, %v539_v3 }
  0xb3   : > { %v541_v5 = vmul.f32 %v540_v4, %v540_v4 }
  0xb5   : > { %v542_v6 = vsel %vm534_vm0, %v541_v5, 0.0 }
  0xb6   : > { %543 = vadd.xlane.f32.xlu0 %v542_v6 }
 0x143   : > { %v544_v15 = vpop.xlane.xlu0 %543 }
 0x144   : > { %v545_v16 = vmul.f32 0.03125, %v544_v15 }
 0x146   : > { %v546_v17 = vadd.f32 1e-12, %v545_v16 }
 0x148   : > { %3732 = vrsqrt.f32 %v546_v17 }
 0x152   : > { %v3733_v18 = vpop.eup %3732 }
 0x153   : > { %v548_v20 = vmul.f32 %v3733_v18, %v540_v4 }
 0x155   : > { %v555_v22 = vmul.f32 %v3255_v19, %v548_v20 }
 0x157   : > { %v4026_v23 = vadd.f32 %v3256_v21, %v555_v22 }
 0x159   : > { %3438 = vmatmul.mubr.msk.f32.vlgmr.msra.gmra.mrb[0].mxu0 %vm534_vm0, %v4026_v23 }
 0x15a   : > { %3442 = vmatprep.mubr.msk.f32.mxu0 %vm3843_vm1, %v3844_v13 }
 0x22c   : > { %v643_v25 = vpop.f32.mrb[0].mxu0 }
 0x22d   : > { %v4035_v26 = vadd.f32 %v3257_v24, %v643_v25  ;;  %v3439_v27 = vpop.f32.mrb[1].mxu0 }
 0x22f   : > { %824 = vrot.lane.b32.xlu0 %v4035_v26, %s4484_s20  ;;  %652 = vrot.lane.b32.xlu1 %v4035_v26, %s3846_s26 }
 0x233   : > { %826 = vrot.lane.b32.xlu1 %v4035_v26, %s3847_s28 }
 0x2a1   : > { %v653_v28 = vpop.permute.xlu1 %652  ;;  %v825_v30 = vpop.permute.xlu0 %824 }
 0x2a2   : > { %3441 = vmatpush3.xpose.msk.msra.mxu0 %vm654_vm2, %v653_v28 }
 0x2a3   : > { %3450 = vmatprep.subr.mxu0 %v3844_v13 }
 0x2a5   : > { %3443 = vmatmul.mubr.msk.f32.vlgmr.msra.gmra.mrb[2].mxu0 %vm654_vm2, %v4035_v26  ;;  %v827_v29 = vpop.permute.xlu1 %826 }
 0x2a6   : > { %3451 = vmatpush3.xpose.msk.msra.mxu0 %vm654_vm2, %v827_v29  ;;  %3452 = vmatprep.mubr.msk.f32.mxu0 %vm3843_vm1, %v3844_v13  ;;  %v649_v29 = vld [vmem:[%s4461_s6 + $0x10] sm:$0xff] }
 0x2a7   : > { %3460 = vmatprep.subr.mxu0 %v3844_v13 }
 0x2a9   : > { %3453 = vmatmul.mubr.msk.f32.vlgmr.msra.gmra.mrb[4].mxu0 %vm654_vm2, %v825_v30 }
 0x2aa   : > { %3462 = vmatprep.mubr.msk.f32.mxu0 %vm3843_vm1, %v3844_v13  ;;  %3461 = vmatpush3.msra.mxu0 %v648_v52 }
 0x2ab   : > { %3470 = vmatprep.subr.mxu0 %v3844_v13 }
 0x378   : > { %v725_v32 = vpop.f32.mrb[2].mxu0 }
 0x379   : > { %v729_v33 = vmul.f32 0.35355338, %v725_v32  ;;  %v3444_v34 = vpop.f32.mrb[3].mxu0 }
 0x37b   : > { %v736_v35 = vadd.f32 %v4058_v31, %v729_v33 }
 0x37c   : > { %v898_v36 = vpop.f32.mrb[4].mxu0 }
 0x37d   : > { %v902_v37 = vmul.f32 0.35355338, %v898_v36  ;;  %v3454_v38 = vpop.f32.mrb[5].mxu0  ;;  %v737_v39 = vsel %vm654_vm2, %v736_v35, -inf }
 0x37e   : > { %738 = vmax.xlane.f32.xlu1 %v737_v39 }
 0x37f   : > { %v903_v40 = vadd.f32 %v4058_v31, %v902_v37 }
 0x381   : > { %v904_v41 = vsel %vm654_vm2, %v903_v40, -inf }
 0x382   : > { %905 = vmax.xlane.f32.xlu0 %v904_v41 }
 0x398   : > { %915 = vrot.lane.b32.xlu0 %v4035_v26, %s4483_s17  ;;  %s4500_s17 = smov 72  }
 0x40b   : > { %v739_v42 = vpop.xlane.xlu1 %738 }
 0x40c   : > { %v740_v43 = vsub.f32 %v736_v35, %v739_v42 }
 0x40e   : > { %v741_v44 = vmul.f32 1.442695, %v740_v43  ;;  %v650_v43 = vld [vmem:[%s4461_s6 + $0x18] sm:$0xff] }
 0x40f   : > { %v906_v45 = vpop.xlane.xlu0 %905 }
 0x410   : > { %3734 = vpow2.f32 %v741_v44  ;;  %v907_v46 = vsub.f32 %v903_v40, %v906_v45 }
 0x412   : > { %v908_v47 = vmul.f32 1.442695, %v907_v46 }
 0x413   : > { %v916_v58 = vpop.permute.xlu0 %915 }
 0x414   : > { %3736 = vpow2.f32 %v908_v47 }
 0x41a   : > { %v3735_v48 = vpop.eup %3734 }
 0x41b   : > { %v743_v49 = vsel %vm654_vm2, %v3735_v48, 0.0 }
 0x41c   : > { %744 = vadd.xlane.f32.xlu1 %v743_v49 }
 0x41e   : > { %v3737_v50 = vpop.eup %3736 }
 0x41f   : > { %v910_v51 = vsel %vm654_vm2, %v3737_v50, 0.0 }
 0x420   : > { %911 = vadd.xlane.f32.xlu1 %v910_v51 }
 0x431   : > { %748 = vrot.lane.b32.xlu1 %v4035_v26, %s4481_s18  ;;  %s3340_s18 = sshll.u32 %s3963_s25, 4  ;;  %s3856_s25 = smov [#allocation2]  }
 0x432   : > { %s4413_s1 = scalar_lea.hbm %s4471_s16, %s3340_s18 }
 0x435   : > { %1139 = vrot.lane.b32.xlu1 %v4035_v26, %s4482_s29 }
 0x439   : > { %1137 = vrot.lane.b32.xlu1 %v4035_v26, %s4480_s19  ;;  %s4499_s19 = smov 112  }
 0x4a9   : > { %v745_v53 = vpop.xlane.xlu1 %744 }
 0x4aa   : > { %3738 = vrcp.f32 %v745_v53  ;;  %v3276_v53 = vld [vmem:[%s4462_s7] ss:$0 sm:$0xff] }
 0x4ad   : > { %v912_v54 = vpop.xlane.xlu1 %911 }
 0x4ae   : > { %3740 = vrcp.f32 %v912_v54 }
 0x4b1   : > { %v749_v55 = vpop.permute.xlu1 %748 }
 0x4b2   : > { %3446 = vmatpush3.msra.mxu1 %v749_v55 }
 0x4b3   : > { %3455 = vmatprep.subr.mxu1 %v3844_v13 }
 0x4b4   : > { %v3739_v56 = vpop.eup %3738 }
 0x4b5   : > { %v747_v57 = vmul.f32 %v3739_v56, %v3735_v48  ;;  %v1140_v0 = vpop.permute.xlu1 %1139 }
 0x4b7   : > { %3448 = vmatmul.mubr.msk.f32.vlgmr.msra.gmra.mrb[0].mxu1 %vm654_vm2, %v747_v57 }
 0x4b8   : > { %v3741_v59 = vpop.eup %3740  ;;  %3456 = vmatpush3.msra.mxu1 %v916_v58  ;;  %3457 = vmatprep.mubr.msk.f32.mxu1 %vm3843_vm1, %v3844_v13 }
 0x4b9   : > { %v914_v60 = vmul.f32 %v3741_v59, %v3737_v50  ;;  %3465 = vmatprep.subr.mxu1 %v3844_v13  ;;  %v1138_v3 = vpop.permute.xlu1 %1137 }
 0x4bb   : > { %3458 = vmatmul.mubr.msk.f32.vlgmr.msra.gmra.mrb[2].mxu1 %vm654_vm2, %v914_v60 }
 0x4bc   : > { %3467 = vmatprep.mubr.msk.f32.mxu1 %vm3843_vm1, %v3844_v13  ;;  %3466 = vmatpush3.msra.mxu1 %v647_v61 }
 0x4bd   : > { %3475 = vmatprep.subr.mxu1 %v3844_v13 }
 0x58a   : > { %v820_v62 = vpop.f32.mrb[0].mxu1 }
 0x58b   : > { %v3449_v63 = vpop.f32.mrb[1].mxu1  ;;  %3468 = vmatmul.mubr.msk.f32.vlgmr.msra.gmra.mrb[4].mxu1 %vm654_vm2, %v820_v62 }
 0x58c   : > { %3477 = vmatprep.mubr.msk.f32.mxu1 %vm3843_vm1, %v3844_v13 }
 0x58e   : > { %v987_v1 = vpop.f32.mrb[2].mxu1 }
 0x58f   : > { %v3459_v2 = vpop.f32.mrb[3].mxu1  ;;  %3463 = vmatmul.mubr.msk.f32.vlgmr.msra.gmra.mrb[6].mxu0 %vm654_vm2, %v987_v1  ;;  %v1658_v1 = vld [vmem:[%s4465_s10 + $0x8] sm:$0xff] }
 0x590   : > { %3471 = vmatpush3.xpose.msk.msra.mxu0 %vm654_vm2, %v1140_v0  ;;  %3472 = vmatprep.mubr.msk.f32.mxu0 %vm3843_vm1, %v3844_v13  ;;  %v1657_v0 = vld [vmem:[%s4465_s10] sm:$0xff] }
 0x591   : > { %3480 = vmatprep.subr.mxu0 %v3844_v13  ;;  %v3638_v2 = vpack.c.bf16 %v1658_v1, %v1657_v0  ;;  %v3290_v1 = vld [vmem:[%s4460_s5 + $0x1] ss:$0 sm:$0xff] }
 0x593   : > { %3473 = vmatmul.mubr.msk.f32.vlgmr.msra.gmra.mrb[8].mxu0 %vm654_vm2, %v1138_v3  ;;  %v1660_v3 = vld [vmem:[%s4465_s10 + $0x18] sm:$0xff] }
 0x594   : > { %3482 = vmatprep.mubr.msk.f32.mxu0 %vm3843_vm1, %v3844_v13  ;;  %3481 = vmatpush3.msra.mxu0 %v649_v29 }
 0x595   : > { %3490 = vmatprep.subr.mxu0 %v3844_v13 }
 0x65e   : > { %v1133_v4 = vpop.f32.mrb[4].mxu1 }
 0x65f   : > { %v3469_v5 = vpop.f32.mrb[5].mxu1 }
 0x662   : > { %v1060_v6 = vpop.f32.mrb[6].mxu0 }
 0x663   : > { %v1134_v7 = vadd.f32 %v1133_v4, %v1060_v6  ;;  %v3464_v8 = vpop.f32.mrb[7].mxu0 }
 0x666   : > { %v1211_v9 = vpop.f32.mrb[8].mxu0 }
 0x667   : > { %v1215_v11 = vmul.f32 0.35355338, %v1211_v9  ;;  %v3474_v12 = vpop.f32.mrb[9].mxu0  ;;  %v3277_v9 = vld [vmem:[%s4463_s8] ss:$0 sm:$0xff] }
 0x668   : > { %v3278_v12 = vld [vmem:[%s4464_s9] ss:$0 sm:$0xff] }
 0x669   : > { %v1216_v14 = vadd.f32 %v4058_v31, %v1215_v11 }
 0x66b   : > { %v1217_v15 = vsel %vm654_vm2, %v1216_v14, -inf }
 0x66c   : > { %1218 = vmax.xlane.f32.xlu1 %v1217_v15 }
 0x67d   : > { %1228 = vrot.lane.b32.xlu1 %v4035_v26, %s4476_s27  ;;  %s4479_s27 = smov 40  }
 0x681   : > { %1378 = vrot.lane.b32.xlu1 %v4035_v26, %s4477_s30  ;;  %s4498_s30 = smov 64  }
 0x6f9   : > { %v1219_v16 = vpop.xlane.xlu1 %1218 }
 0x6fa   : > { %v1220_v17 = vsub.f32 %v1216_v14, %v1219_v16  ;;  %v1746_v16 = vld [vmem:[%s4467_s12] sm:$0xff] }
 0x6fc   : > { %v1221_v18 = vmul.f32 1.442695, %v1220_v17  ;;  %v1747_v17 = vld [vmem:[%s4467_s12 + $0x8] sm:$0xff] }
 0x6fd   : > { %v1229_v19 = vpop.permute.xlu1 %1228 }
 0x6fe   : > { %3742 = vpow2.f32 %v1221_v18  ;;  %3476 = vmatpush3.msra.mxu1 %v1229_v19  ;;  %v3644_v18 = vpack.c.bf16 %v1747_v17, %v1746_v16  ;;  %v1748_v19 = vld [vmem:[%s4467_s12 + $0x10] sm:$0xff] }
 0x6ff   : > { %3485 = vmatprep.subr.mxu1 %v3844_v13 }
 0x701   : > { %v1379_v28 = vpop.permute.xlu1 %1378 }
 0x708   : > { %v3743_v20 = vpop.eup %3742 }
 0x709   : > { %v1223_v21 = vsel %vm654_vm2, %v3743_v20, 0.0 }
 0x70a   : > { %1224 = vadd.xlane.f32.xlu0 %v1223_v21 }
 0x720   : > { %1380 = vrot.lane.b32.xlu0 %v4035_v26, %s4478_s23  ;;  %s4495_s23 = smov 120  }
 0x797   : > { %v1225_v22 = vpop.xlane.xlu0 %1224 }
 0x798   : > { %3744 = vrcp.f32 %v1225_v22  ;;  %v1750_v22 = vld [vmem:[%s4467_s12 + $0x20] sm:$0xff] }
 0x79b   : > { %v1381_v27 = vpop.permute.xlu0 %1380 }
 0x7a2   : > { %v3745_v24 = vpop.eup %3744 }
 0x7a3   : > { %v1227_v25 = vmul.f32 %v3745_v24, %v3743_v20  ;;  %v1749_v20 = vld [vmem:[%s4467_s12 + $0x18] sm:$0xff]  ;;  %v1751_v24 = vld [vmem:[%s4467_s12 + $0x28] sm:$0xff] }
 0x7a4   : > { %v3647_v21 = vpack.c.bf16 %v1749_v20, %v1748_v19 }
 0x7a5   : > { %3478 = vmatmul.mubr.msk.f32.vlgmr.msra.gmra.mrb[6].mxu1 %vm654_vm2, %v1227_v25  ;;  %v3650_v25 = vpack.c.bf16 %v1751_v24, %v1750_v22 }
 0x7a6   : > { %3486 = vmatpush3.xpose.msk.msra.mxu1 %vm654_vm2, %v1381_v27  ;;  %3487 = vmatprep.mubr.msk.f32.mxu1 %vm3843_vm1, %v3844_v13  ;;  %v1752_v27 = vld [vmem:[%s4467_s12 + $0x30] sm:$0xff] }
 0x7a7   : > { %3495 = vmatprep.subr.mxu1 %v3844_v13 }
 0x7a9   : > { %3488 = vmatmul.mubr.msk.f32.vlgmr.msra.gmra.mrb[8].mxu1 %vm654_vm2, %v1379_v28  ;;  %v1753_v28 = vld [vmem:[%s4467_s12 + $0x38] sm:$0xff] }
 0x7aa   : > { %3497 = vmatprep.mubr.msk.f32.mxu1 %vm3843_vm1, %v3844_v13  ;;  %3496 = vmatpush3.msra.mxu1 %v650_v43  ;;  %v3653_v29 = vpack.c.bf16 %v1753_v28, %v1752_v27 }
 0x7ab   : > { %3643 = vmatprep.subr.bf16.mxu1 %v3842_v10 }
 0x878   : > { %v1300_v30 = vpop.f32.mrb[6].mxu1 }
 0x879   : > { %v3479_v32 = vpop.f32.mrb[7].mxu1  ;;  %3483 = vmatmul.mubr.msk.f32.vlgmr.msra.gmra.mrb[10].mxu0 %vm654_vm2, %v1300_v30  ;;  %v3279_v30 = vld [vmem:[%s4466_s11] ss:$0 sm:$0xff] }
 0x87a   : > { %3492 = vmatprep.mubr.msk.f32.mxu0 %vm3843_vm1, %v3844_v13 }
 0x87c   : > { %v1452_v33 = vpop.f32.mrb[8].mxu1 }
 0x87d   : > { %v1456_v34 = vmul.f32 0.35355338, %v1452_v33  ;;  %v3489_v35 = vpop.f32.mrb[9].mxu1 }
 0x87f   : > { %v1457_v36 = vadd.f32 %v4058_v31, %v1456_v34 }
 0x881   : > { %v1458_v37 = vsel %vm654_vm2, %v1457_v36, -inf }
 0x882   : > { %1459 = vmax.xlane.f32.xlu1 %v1458_v37 }
 0x90f   : > { %v1460_v38 = vpop.xlane.xlu1 %1459 }
 0x910   : > { %v1461_v39 = vsub.f32 %v1457_v36, %v1460_v38 }
 0x912   : > { %v1462_v40 = vmul.f32 1.442695, %v1461_v39 }
 0x914   : > { %3746 = vpow2.f32 %v1462_v40  ;;  %v3281_v40 = vld [vmem:[%s4468_s13] ss:$0 sm:$0xff] }
 0x91e   : > { %v3747_v41 = vpop.eup %3746 }
 0x91f   : > { %v1464_v42 = vsel %vm654_vm2, %v3747_v41, 0.0 }
 0x920   : > { %1465 = vadd.xlane.f32.xlu0 %v1464_v42 }
 0x936   : > { %1469 = vrot.lane.b32.xlu0 %v4035_v26, %s4479_s27 }
 0x94c   : > { %v1373_v44 = vpop.f32.mrb[10].mxu0 }
 0x94d   : > { %v1377_v45 = vadd.f32 %v1373_v44, %v1134_v7  ;;  %v3484_v46 = vpop.f32.mrb[11].mxu0 }
 0x9ad   : > { %v1466_v47 = vpop.xlane.xlu0 %1465 }
 0x9ae   : > { %3748 = vrcp.f32 %v1466_v47 }
 0x9b1   : > { %v1470_v48 = vpop.permute.xlu0 %1469 }
 0x9b2   : > { %3491 = vmatpush3.msra.mxu0 %v1470_v48 }
 0x9b3   : > { %3637 = vmatprep.subr.bf16.mxu0 %v3842_v10 }
 0x9b8   : > { %v3749_v49 = vpop.eup %3748 }
 0x9b9   : > { %v1468_v50 = vmul.f32 %v3749_v49, %v3747_v41 }
 0x9bb   : > { %3493 = vmatmul.mubr.msk.f32.vlgmr.msra.gmra.mrb[12].mxu0 %vm654_vm2, %v1468_v50 }
 0x9bc   : > { %3508 = vmatprep.mubr.msk.f32.mxu0 %vm3843_vm1, %v3844_v13  ;;  %3639 = vmatpush3.bf16.msra.mxu0 %v3638_v2 }
 0x9bd   : > { %3640 = vmatprep.subr.bf16.mxu0 %v3842_v10 }
 0xa8e   : > { %v1541_v26 = vpop.f32.mrb[12].mxu0 }
 0xa8f   : > { %v3494_v51 = vpop.f32.mrb[13].mxu0  ;;  %3498 = vmatmul.mubr.msk.f32.vlgmr.msra.gmra.mrb[10].mxu1 %vm654_vm2, %v1541_v26  ;;  %v3285_v26 = vld [vmem:[%s4459_s4 + $0x20] sm:$0xff] }
 0xa90   : > { %3527 = vmatprep.mubr.msk.f32.mxu1 %vm3843_vm1, %v3844_v13  ;;  %3645 = vmatpush3.bf16.msra.mxu1 %v3644_v18  ;;  %v3286_v51 = vld [vmem:[%s4459_s4 + $0x28] sm:$0xff] }
 0xa91   : > { %3646 = vmatprep.subr.bf16.mxu1 %v3842_v10 }
 0xa94   : > { %3648 = vmatpush3.bf16.msra.mxu1 %v3647_v21 }
 0xa95   : > { %3649 = vmatprep.subr.bf16.mxu1 %v3842_v10 }
 0xa98   : > { %3651 = vmatpush3.bf16.msra.mxu1 %v3650_v25 }
 0xa99   : > { %3652 = vmatprep.subr.bf16.mxu1 %v3842_v10 }
 0xa9c   : > { %3654 = vmatpush3.bf16.msra.mxu1 %v3653_v29 }
 0xa9d   : > { %3546 = vmatprep.subr.mxu1 %v3844_v13 }
 0xb62   : > { %v1614_v52 = vpop.f32.mrb[10].mxu1 }
 0xb63   : > { %v1618_v54 = vadd.f32 %v1614_v52, %v1377_v45  ;;  %v3499_v55 = vpop.f32.mrb[11].mxu1  ;;  %v3656_v52 = vpack.c.bf16 %v3286_v51, %v3285_v26 }
 0xb65   : > { %v1626_v56 = vadd.f32 %v3276_v53, %v1618_v54  ;;  %v3287_v53 = vld [vmem:[%s4459_s4 + $0x30] sm:$0xff]  ;;  %v3288_v54 = vld [vmem:[%s4459_s4 + $0x38] sm:$0xff] }
 0xb66   : > { %v3659_v55 = vpack.c.bf16 %v3288_v54, %v3287_v53 }
 0xb67   : > { %v1627_v57 = vadd.f32 %v1626_v56, %v4026_v23  ;;  %v1659_v23 = vld [vmem:[%s4465_s10 + $0x10] sm:$0xff] }
 0xb68   : > { %v3641_v4 = vpack.c.bf16 %v1660_v3, %v1659_v23 }
 0xb69   : > { %v1630_v58 = vsel %vm534_vm0, %v1627_v57, 0.0 }
 0xb6a   : > { %1631 = vadd.xlane.f32.xlu1 %v1630_v58  ;;  %3642 = vmatpush3.bf16.msra.mxu0 %v3641_v4 }
 0xb6b   : > { %3655 = vmatprep.subr.bf16.mxu0 %v3842_v10 }
 0xbf7   : > { %v1632_v59 = vpop.xlane.xlu1 %1631 }
 0xbf8   : > { %v1633_v60 = vmul.f32 0.03125, %v1632_v59 }
 0xbfa   : > { %v1634_v61 = vsub.f32 %v1627_v57, %v1633_v60  ;;  %v3283_v60 = vld [vmem:[%s4469_s14] ss:$0 sm:$0xff] }
 0xbfc   : > { %v1635_v62 = vmul.f32 %v1634_v61, %v1634_v61 }
 0xbfe   : > { %v1636_v63 = vsel %vm534_vm0, %v1635_v62, 0.0  ;;  %v3284_v62 = vld [vmem:[%s4470_s15] ss:$0 sm:$0xff] }
 0xbff   : > { %1637 = vadd.xlane.f32.xlu1 %v1636_v63 }
 0xc8c   : > { %v1638_v5 = vpop.xlane.xlu1 %1637 }
 0xc8d   : > { %v1639_v6 = vmul.f32 0.03125, %v1638_v5 }
 0xc8f   : > { %v1640_v7 = vadd.f32 1e-12, %v1639_v6 }
 0xc91   : > { %3750 = vrsqrt.f32 %v1640_v7 }
 0xc9b   : > { %v3751_v8 = vpop.eup %3750 }
 0xc9c   : > { %v1642_v11 = vmul.f32 %v3751_v8, %v1634_v61 }
 0xc9e   : > { %v1649_v14 = vmul.f32 %v3277_v9, %v1642_v11 }
 0xca0   : > { %v1656_v15 = vadd.f32 %v3278_v12, %v1649_v14 }
 0xca2   : > { %3509 = vmatmul.mubr.msk.f32.vlgmr.msra.gmra.mrb[14].mxu0 %vm534_vm0, %v1656_v15 }
 0xca3   : > { %3538 = vmatprep.mubr.msk.f32.mxu0 %vm3843_vm1, %v3844_v13  ;;  %3657 = vmatpush3.bf16.msra.mxu0 %v3656_v52 }
 0xca4   : > { %3658 = vmatprep.subr.bf16.mxu0 %v3842_v10 }
 0xca7   : > { %3660 = vmatpush3.bf16.msra.mxu0 %v3659_v55 }
 0xca8   : > { %3541 = vmatprep.subr.mxu0 %v3844_v13 }
 0xd75   : > { %v1737_v32 = vpop.f32.mrb[14].mxu0 }
 0xd76   : > { %v1738_v33 = vadd.f32 %v3279_v30, %v1737_v32  ;;  %v3510_v34 = vpop.f32.mrb[15].mxu0  ;;  %v3293_v32 = vld [vmem:[%s4461_s6 + $0x28] sm:$0xff] }
 0xd78   : > { %v1742_v35 = vmul.f32 0.70710677, %v1738_v33  ;;  %v1741_v37 = vmul.f32 0.5, %v1738_v33 }
 0xd7a   : > { %3752 = verf.f32 %v1742_v35 }
 0xd84   : > { %v3753_v36 = vpop.eup %3752 }
 0xd85   : > { %v1744_v38 = vadd.f32 1.0, %v3753_v36 }
 0xd87   : > { %v1745_v39 = vmul.f32 %v1744_v38, %v1741_v37 }
 0xd89   : > { %3528 = vmatmul.mubr.msk.f32.vlgmr.msra.gmra.mrb[12].mxu1 %vm1761_vm3, %v1745_v39 }
 0xd8a   : > { %3548 = vmatprep.mubr.msk.f32.mxu1 %vm3843_vm1, %v3844_v13 }
 0xe5c   : > { %v1831_v41 = vpop.f32.mrb[12].mxu1 }
 0xe5d   : > { %v1832_v42 = vadd.f32 %v3281_v40, %v1831_v41  ;;  %v3529_v43 = vpop.f32.mrb[13].mxu1  ;;  %v3292_v41 = vld [vmem:[%s4461_s6 + $0x20] sm:$0xff] }
 0xe5f   : > { %v1835_v44 = vadd.f32 %v1832_v42, %v1656_v15 }
 0xe61   : > { %v1838_v45 = vsel %vm534_vm0, %v1835_v44, 0.0 }
 0xe62   : > { %1839 = vadd.xlane.f32.xlu1 %v1838_v45 }
 0xeef   : > { %v1840_v46 = vpop.xlane.xlu1 %1839 }
 0xef0   : > { %v1841_v47 = vmul.f32 0.03125, %v1840_v46 }
 0xef2   : > { %v1842_v48 = vsub.f32 %v1835_v44, %v1841_v47 }
 0xef4   : > { %v1843_v49 = vmul.f32 %v1842_v48, %v1842_v48 }
 0xef6   : > { %v1844_v50 = vsel %vm534_vm0, %v1843_v49, 0.0 }
 0xef7   : > { %1845 = vadd.xlane.f32.xlu1 %v1844_v50 }
 0xf84   : > { %v1846_v56 = vpop.xlane.xlu1 %1845 }
 0xf85   : > { %v1847_v57 = vmul.f32 0.03125, %v1846_v56 }
 0xf87   : > { %v1848_v58 = vadd.f32 1e-12, %v1847_v57 }
 0xf89   : > { %3754 = vrsqrt.f32 %v1848_v58 }
 0xf93   : > { %v3755_v59 = vpop.eup %3754 }
 0xf94   : > { %v1850_v61 = vmul.f32 %v3755_v59, %v1842_v48 }
 0xf96   : > { %v1857_v63 = vmul.f32 %v3283_v60, %v1850_v61 }
 0xf98   : > { %v4230_v0 = vadd.f32 %v3284_v62, %v1857_v63 }
 0xf9a   : > { %3539 = vmatmul.mubr.msk.f32.vlgmr.msra.gmra.mrb[16].mxu0 %vm534_vm0, %v4230_v0 }
 0xf9b   : > { %3543 = vmatprep.mubr.msk.f32.mxu0 %vm3843_vm1, %v3844_v13 }
0x106d   : > { %v1947_v2 = vpop.f32.mrb[16].mxu0 }
0x106e   : > { %v4239_v23 = vadd.f32 %v3290_v1, %v1947_v2  ;;  %v3540_v3 = vpop.f32.mrb[17].mxu0 }
0x1070   : > { %2124 = vrot.lane.b32.xlu0 %v4239_v23, %s3847_s28  ;;  %1957 = vrot.lane.b32.xlu1 %v4239_v23, %s3846_s26  ;;  %s4496_s26 = smov 56   ;;  %s4497_s28 = smov 80  }
0x1074   : > { %2122 = vrot.lane.b32.xlu0 %v4239_v23, %s4495_s23  ;;  %s4501_s23 = smov 104  }
0x10e2   : > { %v1958_v4 = vpop.permute.xlu1 %1957  ;;  %v2125_v5 = vpop.permute.xlu0 %2124 }
0x10e3   : > { %3542 = vmatpush3.xpose.msk.msra.mxu0 %vm654_vm2, %v1958_v4 }
0x10e4   : > { %3551 = vmatprep.subr.mxu0 %v3844_v13 }
0x10e6   : > { %3544 = vmatmul.mubr.msk.f32.vlgmr.msra.gmra.mrb[18].mxu0 %vm654_vm2, %v4239_v23  ;;  %v2123_v6 = vpop.permute.xlu0 %2122 }
0x10e7   : > { %3552 = vmatpush3.xpose.msk.msra.mxu0 %vm654_vm2, %v2125_v5  ;;  %3553 = vmatprep.mubr.msk.f32.mxu0 %vm3843_vm1, %v3844_v13  ;;  %v3294_v5 = vld [vmem:[%s4461_s6 + $0x30] sm:$0xff] }
0x10e8   : > { %3561 = vmatprep.subr.mxu0 %v3844_v13 }
0x10ea   : > { %3554 = vmatmul.mubr.msk.f32.vlgmr.msra.gmra.mrb[20].mxu0 %vm654_vm2, %v2123_v6 }
0x10eb   : > { %3563 = vmatprep.mubr.msk.f32.mxu0 %vm3843_vm1, %v3844_v13  ;;  %3562 = vmatpush3.msra.mxu0 %v3293_v32  ;;  %v3313_v32 = vld [vmem:[%s4462_s7 + $0x1] ss:$0 sm:$0xff] }
0x10ec   : > { %3571 = vmatprep.subr.mxu0 %v3844_v13 }
0x11b9   : > { %v2029_v7 = vpop.f32.mrb[18].mxu0 }
0x11ba   : > { %v2033_v8 = vmul.f32 0.35355338, %v2029_v7  ;;  %v3545_v9 = vpop.f32.mrb[19].mxu0 }
0x11bc   : > { %v2034_v11 = vadd.f32 %v4058_v31, %v2033_v8 }
0x11bd   : > { %v2196_v12 = vpop.f32.mrb[20].mxu0 }
0x11be   : > { %v2200_v14 = vmul.f32 0.35355338, %v2196_v12  ;;  %v3555_v15 = vpop.f32.mrb[21].mxu0  ;;  %v2035_v16 = vsel %vm654_vm2, %v2034_v11, -inf }
0x11bf   : > { %2036 = vmax.xlane.f32.xlu0 %v2035_v16 }
0x11c0   : > { %v2201_v17 = vadd.f32 %v4058_v31, %v2200_v14 }
0x11c2   : > { %v2202_v18 = vsel %vm654_vm2, %v2201_v17, -inf }
0x11c3   : > { %2203 = vmax.xlane.f32.xlu1 %v2202_v18 }
0x11d4   : > { %2213 = vrot.lane.b32.xlu1 %v4239_v23, %s4496_s26  ;;  %s4502_s26 = smov 48  }
0x11d8   : > { %2437 = vrot.lane.b32.xlu1 %v4239_v23, %s4497_s28 }
0x124c   : > { %v2037_v19 = vpop.xlane.xlu0 %2036 }
0x124d   : > { %v2038_v20 = vsub.f32 %v2034_v11, %v2037_v19 }
0x124f   : > { %v2039_v21 = vmul.f32 1.442695, %v2038_v20 }
0x1250   : > { %v2204_v22 = vpop.xlane.xlu1 %2203 }
0x1251   : > { %3756 = vpow2.f32 %v2039_v21  ;;  %v2205_v24 = vsub.f32 %v2201_v17, %v2204_v22 }
0x1253   : > { %v2206_v25 = vmul.f32 1.442695, %v2205_v24 }
0x1254   : > { %v2214_v38 = vpop.permute.xlu1 %2213 }
0x1255   : > { %3758 = vpow2.f32 %v2206_v25 }
0x1258   : > { %v2438_v45 = vpop.permute.xlu1 %2437 }
0x125b   : > { %v3757_v27 = vpop.eup %3756 }
0x125c   : > { %v2041_v28 = vsel %vm654_vm2, %v3757_v27, 0.0 }
0x125d   : > { %2042 = vadd.xlane.f32.xlu0 %v2041_v28 }
0x125f   : > { %v3759_v29 = vpop.eup %3758 }
0x1260   : > { %v2208_v30 = vsel %vm654_vm2, %v3759_v29, 0.0 }
0x1261   : > { %2209 = vadd.xlane.f32.xlu0 %v2208_v30 }
0x1277   : > { %2046 = vrot.lane.b32.xlu0 %v4239_v23, %s4498_s30 }
0x127b   : > { %2435 = vrot.lane.b32.xlu0 %v4239_v23, %s4499_s19  ;;  %s4503_s19 = smov 40  }
0x12ea   : > { %v2043_v33 = vpop.xlane.xlu0 %2042 }
0x12eb   : > { %3760 = vrcp.f32 %v2043_v33 }
0x12ee   : > { %v2210_v34 = vpop.xlane.xlu0 %2209 }
0x12ef   : > { %3762 = vrcp.f32 %v2210_v34 }
0x12f2   : > { %v2047_v35 = vpop.permute.xlu0 %2046 }
0x12f3   : > { %3547 = vmatpush3.msra.mxu1 %v2047_v35 }
0x12f4   : > { %3556 = vmatprep.subr.mxu1 %v3844_v13 }
0x12f5   : > { %v3761_v36 = vpop.eup %3760 }
0x12f6   : > { %v2045_v37 = vmul.f32 %v3761_v36, %v3757_v27  ;;  %v2436_v47 = vpop.permute.xlu0 %2435 }
0x12f8   : > { %3549 = vmatmul.mubr.msk.f32.vlgmr.msra.gmra.mrb[14].mxu1 %vm654_vm2, %v2045_v37 }
0x12f9   : > { %v3763_v39 = vpop.eup %3762  ;;  %3557 = vmatpush3.msra.mxu1 %v2214_v38  ;;  %3558 = vmatprep.mubr.msk.f32.mxu1 %vm3843_vm1, %v3844_v13 }
0x12fa   : > { %v2212_v40 = vmul.f32 %v3763_v39, %v3759_v29  ;;  %3566 = vmatprep.subr.mxu1 %v3844_v13 }
0x12fc   : > { %3559 = vmatmul.mubr.msk.f32.vlgmr.msra.gmra.mrb[16].mxu1 %vm654_vm2, %v2212_v40 }
0x12fd   : > { %3568 = vmatprep.mubr.msk.f32.mxu1 %vm3843_vm1, %v3844_v13  ;;  %3567 = vmatpush3.msra.mxu1 %v3292_v41 }
0x12fe   : > { %3576 = vmatprep.subr.mxu1 %v3844_v13 }
0x13cb   : > { %v2118_v42 = vpop.f32.mrb[14].mxu1 }
0x13cc   : > { %v3550_v43 = vpop.f32.mrb[15].mxu1  ;;  %3569 = vmatmul.mubr.msk.f32.vlgmr.msra.gmra.mrb[18].mxu1 %vm654_vm2, %v2118_v42 }
0x13cd   : > { %3578 = vmatprep.mubr.msk.f32.mxu1 %vm3843_vm1, %v3844_v13  ;;  %v3319_v43 = vld [vmem:[%s4465_s10 + $0x28] sm:$0xff] }
0x13cf   : > { %v2285_v44 = vpop.f32.mrb[16].mxu1 }
0x13d0   : > { %v3560_v46 = vpop.f32.mrb[17].mxu1  ;;  %3564 = vmatmul.mubr.msk.f32.vlgmr.msra.gmra.mrb[22].mxu0 %vm654_vm2, %v2285_v44 }
0x13d1   : > { %3572 = vmatpush3.xpose.msk.msra.mxu0 %vm654_vm2, %v2438_v45  ;;  %3573 = vmatprep.mubr.msk.f32.mxu0 %vm3843_vm1, %v3844_v13  ;;  %v3321_v45 = vld [vmem:[%s4465_s10 + $0x38] sm:$0xff] }
0x13d2   : > { %3581 = vmatprep.subr.mxu0 %v3844_v13 }
0x13d4   : > { %3574 = vmatmul.mubr.msk.f32.vlgmr.msra.gmra.mrb[24].mxu0 %vm654_vm2, %v2436_v47 }
0x13d5   : > { %3583 = vmatprep.mubr.msk.f32.mxu0 %vm3843_vm1, %v3844_v13  ;;  %3582 = vmatpush3.msra.mxu0 %v3294_v5 }
0x13d6   : > { %3591 = vmatprep.subr.mxu0 %v3844_v13 }
0x149f   : > { %v2431_v48 = vpop.f32.mrb[18].mxu1 }
0x14a0   : > { %v3570_v49 = vpop.f32.mrb[19].mxu1 }
0x14a3   : > { %v2358_v50 = vpop.f32.mrb[22].mxu0 }
0x14a4   : > { %v2432_v26 = vadd.f32 %v2431_v48, %v2358_v50  ;;  %v3565_v51 = vpop.f32.mrb[23].mxu0 }
0x14a7   : > { %v2509_v52 = vpop.f32.mrb[24].mxu0 }
0x14a8   : > { %v2513_v53 = vmul.f32 0.35355338, %v2509_v52  ;;  %v3575_v54 = vpop.f32.mrb[25].mxu0  ;;  %v3317_v52 = vld [vmem:[%s4464_s9 + $0x1] ss:$0 sm:$0xff] }
0x14aa   : > { %v2514_v55 = vadd.f32 %v4058_v31, %v2513_v53 }
0x14ac   : > { %v2515_v56 = vsel %vm654_vm2, %v2514_v55, -inf }
0x14ad   : > { %2516 = vmax.xlane.f32.xlu1 %v2515_v56  ;;  %v3326_v56 = vld [vmem:[%s4467_s12 + $0x48] sm:$0xff] }
0x14be   : > { %2678 = vrot.lane.b32.xlu1 %v4239_v23, %s4500_s17 }
0x14c2   : > { %2676 = vrot.lane.b32.xlu1 %v4239_v23, %s4501_s23 }
0x153a   : > { %v2517_v57 = vpop.xlane.xlu1 %2516 }
0x153b   : > { %v2518_v58 = vsub.f32 %v2514_v55, %v2517_v57  ;;  %v3325_v55 = vld [vmem:[%s4467_s12 + $0x40] sm:$0xff] }
0x153c   : > { %v3668_v57 = vpack.c.bf16 %v3326_v56, %v3325_v55 }
0x153d   : > { %v2519_v59 = vmul.f32 1.442695, %v2518_v58  ;;  %v3327_v58 = vld [vmem:[%s4467_s12 + $0x50] sm:$0xff] }
0x153e   : > { %v2679_v2 = vpop.permute.xlu1 %2678 }
0x153f   : > { %3764 = vpow2.f32 %v2519_v59  ;;  %v3328_v59 = vld [vmem:[%s4467_s12 + $0x58] sm:$0xff] }
0x1542   : > { %v2677_v4 = vpop.permute.xlu1 %2676 }
0x1549   : > { %v3765_v60 = vpop.eup %3764 }
0x154a   : > { %v2521_v61 = vsel %vm654_vm2, %v3765_v60, 0.0 }
0x154b   : > { %2522 = vadd.xlane.f32.xlu0 %v2521_v61  ;;  %v3329_v61 = vld [vmem:[%s4467_s12 + $0x60] sm:$0xff] }
0x1561   : > { %2526 = vrot.lane.b32.xlu0 %v4239_v23, %s4502_s26  ;;  %s521_s26 = sand.u32 1, %s3832_s22  }
0x1562   : > { %s522_s29 = scalar_lea.vmem [#allocation2], %s521_s26  ;;  %s3174_s28 = scalar_lea.sflag [#allocation3], %s521_s26 }
0x1563   : > { %s3186_s20 = sshll.u32 %s522_s29, 4  ;;  %s4415_s20 = int_to_ptr.vmem [resolvable:$true] %s3186_s20 }
0x1564   : > { %s3778_s30 = scalar_lea.vmem %s4415_s20, 16 }
0x1565   : > { %p3779_p11 = scmp.ne.s32.totalorder %s4415_s20, %s3778_s30 }
0x1567   : > { %p3780_p12 = pnand %p3779_p11, %p3980_p5 }
0x1569   : > { %p3781_p13 = pneg %p3780_p12 }
0x15d8   : > { %v2523_v62 = vpop.xlane.xlu0 %2522 }
0x15d9   : > { %3766 = vrcp.f32 %v2523_v62  ;;  %v3330_v62 = vld [vmem:[%s4467_s12 + $0x68] sm:$0xff] }
0x15dc   : > { %v2527_v63 = vpop.permute.xlu0 %2526 }
0x15dd   : > { %3577 = vmatpush3.msra.mxu1 %v2527_v63  ;;  %v3674_v63 = vpack.c.bf16 %v3330_v62, %v3329_v61 }
0x15de   : > { %3586 = vmatprep.subr.mxu1 %v3844_v13 }
0x15e3   : > { %v3767_v1 = vpop.eup %3766 }
0x15e4   : > { %v2525_v3 = vmul.f32 %v3767_v1, %v3765_v60  ;;  %v3671_v60 = vpack.c.bf16 %v3328_v59, %v3327_v58  ;;  %v3331_v1 = vld [vmem:[%s4467_s12 + $0x70] sm:$0xff] }
0x15e6   : > { %3579 = vmatmul.mubr.msk.f32.vlgmr.msra.gmra.mrb[20].mxu1 %vm654_vm2, %v2525_v3 }
0x15e7   : > { %3587 = vmatpush3.xpose.msk.msra.mxu1 %vm654_vm2, %v2679_v2  ;;  %3588 = vmatprep.mubr.msk.f32.mxu1 %vm3843_vm1, %v3844_v13  ;;  %v3332_v2 = vld [vmem:[%s4467_s12 + $0x78] sm:$0xff] }
0x15e8   : > { %3596 = vmatprep.subr.mxu1 %v3844_v13  ;;  %v3677_v3 = vpack.c.bf16 %v3332_v2, %v3331_v1 }
0x15ea   : > { %3589 = vmatmul.mubr.msk.f32.vlgmr.msra.gmra.mrb[22].mxu1 %vm654_vm2, %v2677_v4  ;;  %v3323_v4 = vld [vmem:[%s4466_s11 + $0x1] ss:$0 sm:$0xff] }
0x15eb   : > { %3598 = vmatprep.mubr.msk.f32.mxu1 %vm3843_vm1, %v3844_v13 }
0x16b9   : > { %v2598_v6 = vpop.f32.mrb[20].mxu1 }
0x16ba   : > { %v3580_v7 = vpop.f32.mrb[21].mxu1  ;;  %3584 = vmatmul.mubr.msk.f32.vlgmr.msra.gmra.mrb[26].mxu0 %vm654_vm2, %v2598_v6 }
0x16bb   : > { %3593 = vmatprep.mubr.msk.f32.mxu0 %vm3843_vm1, %v3844_v13 }
0x16bd   : > { %v2750_v8 = vpop.f32.mrb[22].mxu1 }
0x16be   : > { %v2754_v9 = vmul.f32 0.35355338, %v2750_v8  ;;  %v3590_v11 = vpop.f32.mrb[23].mxu1 }
0x16c0   : > { %v2755_v12 = vadd.f32 %v4058_v31, %v2754_v9  ;;  %v3295_v31 = vld [vmem:[%s4461_s6 + $0x38] sm:$0xff] }
0x16c1   : > { %3597 = vmatpush3.msra.mxu1 %v3295_v31 }
0x16c2   : > { %v2756_v14 = vsel %vm654_vm2, %v2755_v12, -inf  ;;  %3667 = vmatprep.subr.bf16.mxu1 %v3842_v10 }
0x16c3   : > { %2757 = vmax.xlane.f32.xlu0 %v2756_v14  ;;  %v3334_v14 = vld [vmem:[%s4468_s13 + $0x1] ss:$0 sm:$0xff] }
0x16d9   : > { %2767 = vrot.lane.b32.xlu0 %v4239_v23, %s4503_s19  ;;  %s3782_s19 = sshll.u32 %s3856_s25, 4  ;;  %s3783_s19 = int_to_ptr.vmem [resolvable:$false] %s3782_s19 }
0x16da   : > { %s3784_s27 = scalar_lea.vmem %s3783_s19, 32  ;;  %p3785_p0 = scmp.lt.s32.totalorder %s4415_s20, %s3783_s19 }
0x16db   : > { %p3786_p1 = scmp.lt.s32.totalorder %s3784_s27, %s3778_s30 }
0x16dd   : > { %p3787_p2 = por %p3786_p1, %p3785_p0 }
0x16df   : > { %p3788_p3 = pnand %p3787_p2, %p3781_p13 }
0x1750   : > { %v2758_v15 = vpop.xlane.xlu0 %2757 }
0x1751   : > { %v2759_v16 = vsub.f32 %v2755_v12, %v2758_v15 }
0x1753   : > { %v2760_v17 = vmul.f32 1.442695, %v2759_v16 }
0x1754   : > { %v2768_v18 = vpop.permute.xlu0 %2767 }
0x1755   : > { %3768 = vpow2.f32 %v2760_v17  ;;  %3592 = vmatpush3.msra.mxu0 %v2768_v18 }
0x1756   : > { %3661 = vmatprep.subr.bf16.mxu0 %v3842_v10 }
0x175f   : > { %v3769_v19 = vpop.eup %3768 }
0x1760   : > { %v2762_v20 = vsel %vm654_vm2, %v3769_v19, 0.0 }
0x1761   : > { %2763 = vadd.xlane.f32.xlu1 %v2762_v20 }
0x178d   : > { %v2671_v23 = vpop.f32.mrb[26].mxu0 }
0x178e   : > { %v2675_v21 = vadd.f32 %v2671_v23, %v2432_v26  ;;  %v3585_v22 = vpop.f32.mrb[27].mxu0  ;;  %v3316_v26 = vld [vmem:[%s4463_s8 + $0x1] ss:$0 sm:$0xff] }
0x17ee   : > { %v2764_v24 = vpop.xlane.xlu1 %2763 }
0x17ef   : > { %3770 = vrcp.f32 %v2764_v24 }
0x17f9   : > { %v3771_v25 = vpop.eup %3770 }
0x17fa   : > { %v2766_v27 = vmul.f32 %v3771_v25, %v3769_v19 }
0x17fc   : > { %3594 = vmatmul.mubr.msk.f32.vlgmr.msra.gmra.mrb[28].mxu0 %vm654_vm2, %v2766_v27 }
0x17fd   : > { %3609 = vmatprep.mubr.msk.f32.mxu0 %vm3843_vm1, %v3844_v13 }
0x18cf   : > { %v2839_v28 = vpop.f32.mrb[28].mxu0 }
0x18d0   : > { %v3595_v29 = vpop.f32.mrb[29].mxu0  ;;  %3599 = vmatmul.mubr.msk.f32.vlgmr.msra.gmra.mrb[24].mxu1 %vm654_vm2, %v2839_v28 }
0x18d1   : > { %3628 = vmatprep.mubr.msk.f32.mxu1 %vm3843_vm1, %v3844_v13  ;;  %v3318_v13 = vld [vmem:[%s4465_s10 + $0x20] sm:$0xff]  ;;  %3669 = vmatpush3.bf16.msra.mxu1 %v3668_v57 }
0x18d2   : > { %v3662_v44 = vpack.c.bf16 %v3319_v43, %v3318_v13  ;;  %3670 = vmatprep.subr.bf16.mxu1 %v3842_v10  ;;  %v3338_v29 = vld [vmem:[%s4469_s14 + $0x1] ss:$0 sm:$0xff] }
0x18d4   : > { %3663 = vmatpush3.bf16.msra.mxu0 %v3662_v44 }
0x18d5   : > { %3664 = vmatprep.subr.bf16.mxu0 %v3842_v10  ;;  %3672 = vmatpush3.bf16.msra.mxu1 %v3671_v60 }
0x18d6   : > { %3673 = vmatprep.subr.bf16.mxu1 %v3842_v10 }
0x18d9   : > { %3675 = vmatpush3.bf16.msra.mxu1 %v3674_v63 }
0x18da   : > { %3676 = vmatprep.subr.bf16.mxu1 %v3842_v10 }
0x18dd   : > { %3678 = vmatpush3.bf16.msra.mxu1 %v3677_v3 }
0x19a3   : > { %v2912_v30 = vpop.f32.mrb[24].mxu1 }
0x19a4   : > { %v2916_v33 = vadd.f32 %v2912_v30, %v2675_v21  ;;  %v3600_v34 = vpop.f32.mrb[25].mxu1 }
0x19a6   : > { %v2925_v35 = vadd.f32 %v3313_v32, %v2916_v33  ;;  %v3339_v32 = vld [vmem:[%s4470_s15 + $0x1] ss:$0 sm:$0xff] }
0x19a8   : > { %v2926_v36 = vadd.f32 %v2925_v35, %v4230_v0  ;;  %v3320_v0 = vld [vmem:[%s4465_s10 + $0x30] sm:$0xff] }
0x19a9   : > { %v3665_v46 = vpack.c.bf16 %v3321_v45, %v3320_v0 }
0x19aa   : > { %v2931_v37 = vsel %vm534_vm0, %v2926_v36, 0.0 }
0x19ab   : > { %2932 = vadd.xlane.f32.xlu1 %v2931_v37  ;;  %3666 = vmatpush3.bf16.msra.mxu0 %v3665_v46 }
0x1a38   : > { %v2933_v38 = vpop.xlane.xlu1 %2932 }
0x1a39   : > { %v2934_v39 = vmul.f32 0.03125, %v2933_v38 }
0x1a3b   : > { %v2935_v40 = vsub.f32 %v2926_v36, %v2934_v39 }
0x1a3d   : > { %v2936_v41 = vmul.f32 %v2935_v40, %v2935_v40 }
0x1a3f   : > { %v2937_v42 = vsel %vm534_vm0, %v2936_v41, 0.0 }
0x1a40   : > { %2938 = vadd.xlane.f32.xlu1 %v2937_v42 }
0x1acd   : > { %v2939_v47 = vpop.xlane.xlu1 %2938 }
0x1ace   : > { %v2940_v48 = vmul.f32 0.03125, %v2939_v47 }
0x1ad0   : > { %v2941_v49 = vadd.f32 1e-12, %v2940_v48 }
0x1ad2   : > { %3772 = vrsqrt.f32 %v2941_v49 }
0x1adc   : > { %v3773_v50 = vpop.eup %3772 }
0x1add   : > { %v2943_v51 = vmul.f32 %v3773_v50, %v2935_v40 }
0x1adf   : > { %v2950_v53 = vmul.f32 %v3316_v26, %v2943_v51 }
0x1ae1   : > { %v2957_v54 = vadd.f32 %v3317_v52, %v2950_v53 }
0x1ae3   : > { %3610 = vmatmul.mubr.msk.f32.vlgmr.msra.gmra.mrb[30].mxu0 %vm534_vm0, %v2957_v54 }
0x1bb6   : > { %v3040_v5 = vpop.f32.mrb[30].mxu0 }
0x1bb7   : > { %v3041_v6 = vadd.f32 %v3323_v4, %v3040_v5  ;;  %v3611_v7 = vpop.f32.mrb[31].mxu0 }
0x1bb9   : > { %v3045_v8 = vmul.f32 0.70710677, %v3041_v6  ;;  %v3044_v9 = vmul.f32 0.5, %v3041_v6 }
0x1bbb   : > { %3774 = verf.f32 %v3045_v8 }
0x1bc5   : > { %v3775_v10 = vpop.eup %3774 }
0x1bc6   : > { %v3047_v11 = vadd.f32 1.0, %v3775_v10 }
0x1bc8   : > { %v3048_v12 = vmul.f32 %v3047_v11, %v3044_v9 }
0x1bca   : > { %3629 = vmatmul.mubr.msk.f32.vlgmr.msra.gmra.mrb[26].mxu1 %vm1761_vm3, %v3048_v12 }
0x1c9d   : > { %v3135_v15 = vpop.f32.mrb[26].mxu1 }
0x1c9e   : > { %v3136_v16 = vadd.f32 %v3334_v14, %v3135_v15  ;;  %v3630_v17 = vpop.f32.mrb[27].mxu1 }
0x1ca0   : > { %v3139_v18 = vadd.f32 %v3136_v16, %v2957_v54 }
0x1ca2   : > { %v3144_v19 = vsel %vm534_vm0, %v3139_v18, 0.0 }
0x1ca3   : > { %3145 = vadd.xlane.f32.xlu1 %v3144_v19 }
0x1d30   : > { %v3146_v20 = vpop.xlane.xlu1 %3145 }
0x1d31   : > { %v3147_v31 = vmul.f32 0.03125, %v3146_v20 }
0x1d33   : > { %v3148_v23 = vsub.f32 %v3139_v18, %v3147_v31 }
0x1d35   : > { %v3149_v21 = vmul.f32 %v3148_v23, %v3148_v23 }
0x1d37   : > { %v3150_v22 = vsel %vm534_vm0, %v3149_v21, 0.0 }
0x1d38   : > { %3151 = vadd.xlane.f32.xlu1 %v3150_v22 }
0x1dc5   : > { %v3152_v24 = vpop.xlane.xlu1 %3151 }
0x1dc6   : > { %v3153_v25 = vmul.f32 0.03125, %v3152_v24 }
0x1dc8   : > { %v3154_v27 = vadd.f32 1e-12, %v3153_v25 }
0x1dca   : > { %3776 = vrsqrt.f32 %v3154_v27 }
0x1dd4   : > { %v3777_v28 = vpop.eup %3776 }
0x1dd5   : > { %v3156_v30 = vmul.f32 %v3777_v28, %v3148_v23 }
0x1dd7   : > { %v3163_v33 = vmul.f32 %v3338_v29, %v3156_v30 }
0x1dd9   : > { %v3170_v34 = vadd.f32 %v3339_v32, %v3163_v33 }
0x1ddb   : > { %3172 = vst.msk [vmem:[%s522_s29] sm:$0x1] %vm3171_vm4, %v3170_v34 }
0x1ddc   : > { %3791 = shalt.err (!%p3788_p3)
}
0x1ddd   : > { %s3792_s26 = scalar_lea.hbm %s4413_s1, 16  ;;  %s3796_s17 = scalar_lea.hbm %s4471_s16, 32 }
0x1dde   : > { %p3793_p4 = scmp.ne.s32.totalorder %s4413_s1, %s3792_s26  ;;  %p3797_p9 = scmp.lt.u32.totalorder %s4413_s1, %s4471_s16 }
0x1ddf   : > { %p3798_p10 = scmp.lt.u32.totalorder %s3796_s17, %s3792_s26  ;;  %p3800_p12 = scmp.lt.u32.totalorder %s3792_s26, %s4413_s1 }
0x1de0   : > { %p3794_p7 = pnand %p3793_p4, %p3980_p5 }
0x1de1   : > { %p3799_p11 = por %p3798_p10, %p3797_p9 }
0x1de2   : > { %p3795_p8 = pneg %p3794_p7 }
0x1de3   : > { %p3801_p13 = por %p3800_p12, %p3799_p11 }
0x1de5   : > { %p3802_p0 = pnand %p3801_p13, %p3795_p8 }
0x1de7   : > { %3805 = shalt.err (!%p3802_p0)
}
0x1de8   : > { %3679 = dma.vmem_to_hbm [thread:$0]  (%p3980_p5), %s4415_s20, 16, %s4413_s1, %s3174_s28  }
0x1de9 PF: > { %p3685_p1 = scmp.ge.s32.totalorder %s3840_s24, 2  ;;  %s3198_s19 = sand.u32 1, %s3828_s21  }
0x1dea   : > { %s3199_s27 = scalar_lea.sflag [#allocation3], %s3198_s19 }
0x1deb   : > { %p3682_p2 = pnand %p3685_p1, %p3984_p6 }
0x1ded   : > { %3823 = dma.done.wait (!%p3682_p2), %s3199_s27, 16  }
0x1dee   : > { %3825 = vsyncadd (!%p3682_p2), %s3199_s27, 4294967280  ;;  %s4505_s24 = sld [smem:[#allocation6_spill]]  ;;  %s4506_s26 = sld [smem:[#allocation5_spill]] }
0x1def   : > { %s4507_s23 = sld [smem:[#allocation7_spill]]  ;;  %s4508_s21 = smov %s3832_s22 }
0x1df4   : > { %p26_p3 = scmp.ge.s32.totalorder %s4505_s24, 4   ;;  %s4509_s22 = smov %s4506_s26 }
0x1df6   :  { %28 = sbr.rel (!%p26_p3) target bundleno = 6 (0x6), region = 134 }
0x1dfd   :  { %3203 = vsyncpa [#allocation3], 1 }
0x1dfe   :  { %3205 = vsyncpa [#allocation3 + $0x1], 1 }

</bundles_post_ra>
